<compile_context>
chip_gen: v5e
topology: v5e:2x2
jax: 0.10.0
libtpu: 0.0.40
codegen_flags: <defaults>
</compile_context>

<pallas_src>
import functools

import jax
import jax.numpy as jnp
from jax.experimental import pallas as pl
from jax.experimental.pallas import tpu as pltpu


def _se_kernel(x_ref, w1t_ref, w2t_ref, o_ref, *, inv_hw):
    # x_ref : (TB, C, HWp)  input block (spatial padded to a multiple of 128)
    # w1t_ref: (Cr, C)      == fc1.weight  (PyTorch (out, in) layout)
    # w2t_ref: (C, Cr)      == fc2.weight
    # o_ref : (TB, C, HWp)

    # 1. Global average pool over the (padded) spatial axis. Zero padding does
    #    not change the sum; divide by the true HW. Accumulate in f32.
    y = jnp.sum(x_ref[...].astype(jnp.float32), axis=-1) * jnp.float32(inv_hw)  # (TB, C)

    # 2. FC1 (C -> Cr) + ReLU on the VPU: contraction over C is a lane reduce.
    w1t = w1t_ref[...].astype(jnp.float32)                       # (Cr, C)
    h = jnp.sum(y[:, None, :] * w1t[None, :, :], axis=-1)        # (TB, Cr)
    h = jnp.maximum(h, 0.0)

    # 3. FC2 (Cr -> C) + sigmoid on the VPU. The contraction over Cr is a lane
    #    reduce and the result comes out as (TB, C, 1) with C already on the
    #    sublane axis, so the rescale below broadcasts along lanes with no
    #    relayout of the scale.
    w2t = w2t_ref[...].astype(jnp.float32)                       # (C, Cr)
    s = jnp.sum(h[:, None, :] * w2t[None, :, :], axis=-1, keepdims=True)  # (TB, C, 1)
    s = jax.nn.sigmoid(s)

    # 4. Channel-wise rescale in the activation dtype (no wholesale f32 upcast
    #    of the block for the store path).
    o_ref[...] = x_ref[...] * s.astype(o_ref.dtype)


def se_block(x, w_fc1, w_fc2, *, vmem_block_budget_bytes=20 * 1024 * 1024):
    """SE block forward.

    x     : (B, C, H, W)        activations (NCHW, like the PyTorch module)
    w_fc1 : (C//ratio, C)       == fc[0].weight (Linear(C, C//ratio, bias=False))
    w_fc2 : (C, C//ratio)       == fc[2].weight (Linear(C//ratio, C, bias=False))
    returns (B, C, H, W)
    """
    b, c, h, w = x.shape
    cr = w_fc1.shape[0]
    assert w_fc1.shape == (cr, c), "w_fc1 must be fc1.weight with shape (C//ratio, C)"
    assert w_fc2.shape == (c, cr), "w_fc2 must be fc2.weight with shape (C, C//ratio)"

    hw = h * w
    inv_hw = 1.0 / float(hw)

    # Lane-dense output: pad the flattened spatial axis up to a multiple of 128.
    hwp = ((hw + 127) // 128) * 128
    x_flat = x.reshape(b, c, hw)
    if hwp != hw:
        x_flat = jnp.pad(x_flat, ((0, 0), (0, 0), (0, hwp - hw)))

    # Batch-tile size: largest TB whose double-buffered in+out blocks fit the
    # VMEM budget (safe for v7x's 64 MiB physical / 32 MiB scoped VMEM), while
    # keeping >= 2 grid steps so the parallel axis shards across TensorCores.
    bytes_per_row = c * hwp * x.dtype.itemsize
    tb = max(1, vmem_block_budget_bytes // (4 * bytes_per_row))
    if b >= 2:
        tb = min(tb, b // 2)
    tb = int(min(tb, b))

    # Pad the batch so it divides evenly into TB-sized tiles (padded rows pool
    # to zero and their outputs are sliced off; no NaN risk).
    bp = pl.cdiv(b, tb) * tb
    if bp != b:
        x_flat = jnp.pad(x_flat, ((0, bp - b), (0, 0), (0, 0)))

    grid = (bp // tb,)
    kernel = functools.partial(_se_kernel, inv_hw=inv_hw)

    cost = pl.CostEstimate(
        flops=int(2 * bp * c * hwp + 4 * bp * c * cr),
        transcendentals=int(bp * c),
        bytes_accessed=int(
            2 * bp * c * hwp * x.dtype.itemsize + 2 * c * cr * w_fc1.dtype.itemsize
        ),
    )

    out_flat = pl.pallas_call(
        kernel,
        out_shape=jax.ShapeDtypeStruct((bp, c, hwp), x.dtype),
        grid_spec=pltpu.PrefetchScalarGridSpec(
            num_scalar_prefetch=0,
            grid=grid,
            in_specs=[
                pl.BlockSpec((tb, c, hwp), lambda i: (i, 0, 0)),
                pl.BlockSpec((cr, c), lambda i: (0, 0)),   # fc1.weight, resident
                pl.BlockSpec((c, cr), lambda i: (0, 0)),   # fc2.weight, resident
            ],
            out_specs=pl.BlockSpec((tb, c, hwp), lambda i: (i, 0, 0)),
        ),
        compiler_params=pltpu.CompilerParams(
            dimension_semantics=("parallel",),
            vmem_limit_bytes=32 * 1024 * 1024,
        ),
        cost_estimate=cost,
    )(x_flat, w_fc1, w_fc2)

    return out_flat[:b, :, :hw].reshape(b, c, h, w)


def se_block_reference(x, w_fc1, w_fc2):
    """Pure-JAX reference matching the PyTorch SE_Block semantics."""
    y = jnp.mean(x, axis=(2, 3))                     # AdaptiveAvgPool2d((1,1))
    y = jnp.maximum(y @ w_fc1.T, 0.0)                # Linear + ReLU
    y = jax.nn.sigmoid(y @ w_fc2.T)                  # Linear + Sigmoid
    return x * y[:, :, None, None]


if __name__ == "__main__":
    key = jax.random.PRNGKey(0)
    k_x, k_w1, k_w2 = jax.random.split(key, 3)

    # inchannel=64, ratio=16 -> hidden=4 (matches the module's defaults)
    B, C, H, W = 4, 64, 16, 16
    ratio = 16
    Cr = C // ratio

    x = jax.random.normal(k_x, (B, C, H, W), dtype=jnp.float32)
    w_fc1 = jax.random.normal(k_w1, (Cr, C), dtype=jnp.float32) * 0.1   # fc1.weight
    w_fc2 = jax.random.normal(k_w2, (C, Cr), dtype=jnp.float32) * 0.1   # fc2.weight

    out = jax.block_until_ready(se_block(x, w_fc1, w_fc2))
    ref = se_block_reference(x, w_fc1, w_fc2)

    assert out.shape == (B, C, H, W)
    assert jnp.allclose(out, ref, atol=1e-4, rtol=1e-4), "mismatch vs reference"

    print("KERNEL_OK")
</pallas_src>

<mosaic_0001>
module attributes {stable_mosaic.version = 11 : i64} {
  func.func @_se_kernel(%arg0: i32, %arg1: memref<2x64x256xf32, #tpu.memory_space<vmem>>, %arg2: memref<4x64xf32, #tpu.memory_space<vmem>>, %arg3: memref<64x4xf32, #tpu.memory_space<vmem>>, %arg4: memref<2x64x256xf32, #tpu.memory_space<vmem>>) attributes {dimension_semantics = [#tpu.dimension_semantics<parallel>], iteration_bounds = array<i64: 2>, scalar_prefetch = 0 : i64, scratch_operands = 0 : i64, tpu.core_type = #tpu.core_type<tc>, window_params = [{transform_indices = @transform_0, window_bounds = array<i64: 2, 64, 256>}, {pipeline_mode = #tpu.pipeline_mode<synchronous>, transform_indices = @transform_1, window_bounds = array<i64: 4, 64>}, {pipeline_mode = #tpu.pipeline_mode<synchronous>, transform_indices = @transform_2, window_bounds = array<i64: 64, 4>}, {transform_indices = @transform_3, window_bounds = array<i64: 2, 64, 256>}]} {
    %c0 = arith.constant 0 : index
    %c0_0 = arith.constant 0 : index
    %c0_1 = arith.constant 0 : index
    %0 = vector.load %arg1[%c0, %c0_0, %c0_1] : memref<2x64x256xf32, #tpu.memory_space<vmem>>, vector<2x64x256xf32>
    %cst = arith.constant dense<0.000000e+00> : vector<2x64xf32>
    %1 = vector.multi_reduction <add>, %0, %cst [2] : vector<2x64x256xf32> to vector<2x64xf32>
    %cst_2 = arith.constant 3.906250e-03 : f32
    %2 = vector.broadcast %cst_2 : f32 to vector<2x64xf32>
    %3 = arith.mulf %1, %2 : vector<2x64xf32>
    %c0_3 = arith.constant 0 : index
    %c0_4 = arith.constant 0 : index
    %4 = vector.load %arg2[%c0_3, %c0_4] : memref<4x64xf32, #tpu.memory_space<vmem>>, vector<4x64xf32>
    %5 = vector.shape_cast %3 : vector<2x64xf32> to vector<2x1x64xf32>
    %6 = vector.shape_cast %4 : vector<4x64xf32> to vector<1x4x64xf32>
    %7 = vector.broadcast %5 : vector<2x1x64xf32> to vector<2x4x64xf32>
    %8 = vector.broadcast %6 : vector<1x4x64xf32> to vector<2x4x64xf32>
    %9 = arith.mulf %7, %8 : vector<2x4x64xf32>
    %cst_5 = arith.constant dense<0.000000e+00> : vector<2x4xf32>
    %10 = vector.multi_reduction <add>, %9, %cst_5 [2] : vector<2x4x64xf32> to vector<2x4xf32>
    %cst_6 = arith.constant 0.000000e+00 : f32
    %11 = vector.broadcast %cst_6 : f32 to vector<2x4xf32>
    %12 = arith.maximumf %10, %11 : vector<2x4xf32>
    %c0_7 = arith.constant 0 : index
    %c0_8 = arith.constant 0 : index
    %13 = vector.load %arg3[%c0_7, %c0_8] : memref<64x4xf32, #tpu.memory_space<vmem>>, vector<64x4xf32>
    %14 = vector.shape_cast %12 : vector<2x4xf32> to vector<2x1x4xf32>
    %15 = vector.shape_cast %13 : vector<64x4xf32> to vector<1x64x4xf32>
    %16 = vector.broadcast %14 : vector<2x1x4xf32> to vector<2x64x4xf32>
    %17 = vector.broadcast %15 : vector<1x64x4xf32> to vector<2x64x4xf32>
    %18 = arith.mulf %16, %17 : vector<2x64x4xf32>
    %cst_9 = arith.constant dense<0.000000e+00> : vector<2x64xf32>
    %19 = vector.multi_reduction <add>, %18, %cst_9 [2] : vector<2x64x4xf32> to vector<2x64xf32>
    %20 = vector.shape_cast %19 : vector<2x64xf32> to vector<2x64x1xf32>
    %21 = arith.negf %20 : vector<2x64x1xf32>
    %22 = math.exp %21 : vector<2x64x1xf32>
    %cst_10 = arith.constant 1.000000e+00 : f32
    %23 = vector.broadcast %cst_10 : f32 to vector<2x64x1xf32>
    %24 = arith.addf %23, %22 : vector<2x64x1xf32>
    %25 = arith.divf %23, %24 : vector<2x64x1xf32>
    %c0_11 = arith.constant 0 : index
    %c0_12 = arith.constant 0 : index
    %c0_13 = arith.constant 0 : index
    %26 = vector.load %arg1[%c0_11, %c0_12, %c0_13] : memref<2x64x256xf32, #tpu.memory_space<vmem>>, vector<2x64x256xf32>
    %27 = vector.broadcast %25 : vector<2x64x1xf32> to vector<2x64x256xf32>
    %28 = arith.mulf %26, %27 : vector<2x64x256xf32>
    %c0_14 = arith.constant 0 : index
    %c0_15 = arith.constant 0 : index
    %c0_16 = arith.constant 0 : index
    %29 = vector.load %arg4[%c0_14, %c0_15, %c0_16] : memref<2x64x256xf32, #tpu.memory_space<vmem>>, vector<2x64x256xf32>
    tpu.vector_store %arg4[%c0_14, %c0_15, %c0_16], %28 {strides = array<i32>} : memref<2x64x256xf32, #tpu.memory_space<vmem>>, vector<2x64x256xf32>,
    return
  }
  func.func @transform_0(%arg0: i32) -> (i32, i32, i32) {
    %c0_i32 = arith.constant 0 : i32
    %c0_i32_0 = arith.constant 0 : i32
    %c0_i32_1 = arith.constant 0 : i32
    return %arg0, %c0_i32, %c0_i32_0 : i32, i32, i32
  }
  func.func @transform_1(%arg0: i32) -> (i32, i32) {
    %c0_i32 = arith.constant 0 : i32
    %c0_i32_0 = arith.constant 0 : i32
    %c0_i32_1 = arith.constant 0 : i32
    return %c0_i32, %c0_i32_0 : i32, i32
  }
  func.func @transform_2(%arg0: i32) -> (i32, i32) {
    %c0_i32 = arith.constant 0 : i32
    %c0_i32_0 = arith.constant 0 : i32
    %c0_i32_1 = arith.constant 0 : i32
    return %c0_i32, %c0_i32_0 : i32, i32
  }
  func.func @transform_3(%arg0: i32) -> (i32, i32, i32) {
    %c0_i32 = arith.constant 0 : i32
    %c0_i32_0 = arith.constant 0 : i32
    %c0_i32_1 = arith.constant 0 : i32
    return %arg0, %c0_i32, %c0_i32_0 : i32, i32, i32
  }
}

</mosaic_0001>

<bundles_post_ra>
// kernel: tpu_custom_call.1
= control target key start
LH: loop header
LB: loop body
LE: loop exit
PB: predicated region body
PF: predicated region fallthrough
CT: control target
= control target key end

     0   :  { %8 = vsyncpa [#allocation3], 0  ;;  %s5162_s0 = inlined_call_operand.hbm [shape: f32[4,64,256], index: 0, kind: input, shape index: {}]   ;;  %s5163_s1 = inlined_call_operand.vmem [shape: f32[4,64], index: 1, kind: input, shape index: {}]   ;;  %s5164_s2 = inlined_call_operand.vmem [shape: f32[64,4], index: 2, kind: input, shape index: {}]   ;;  %s5165_s3 = inlined_call_operand.hbm [shape: f32[4,64,256], index: 3, kind: output, shape index: {}]  }
   0x1   :  { %10 = vsyncpa [#allocation3 + $0x1], 0 }
   0x2   :  { %11 = vsyncpa [#allocation4], 0 }
   0x3   :  { %13 = vsyncpa [#allocation4 + $0x1], 0  ;;  %s3278_s12 = smov 0   ;;  %s3280_s13 = smov 0  }
   0x4   :  { %s3282_s14 = smov 0   ;;  %s3284_s15 = smov 0  }
   0x5 LB: > { %s3299_s16 = sadd.s32 4294967295, %s3251_s15   ;;  %s2931_s17 = sadd.s32 4294967294, %s3251_s15   ;;  %s3251_s15 = sphi %s3284_s15, %s5254_s15   ;;  %s3247_s14 = sphi %s3282_s14, %s5253_s14   ;;  %s3243_s13 = sphi %s3280_s13, %s5252_s13   ;;  %s3239_s12 = sphi %s3278_s12, %s5251_s12  }
   0x6   : > { %s3303_s18 = sadd.s32 1, %s3251_s15   ;;  %s26_s19 = sadd.s32 1, %s3247_s14 }
   0x7   : > { %s23_s20 = ssub.s32 %s3251_s15, %s3303_s18  ;;  %p33_p0 = scmp.ne.s32.totalorder %s3247_s14, %s3243_s13 }
   0x8   : > { %p24_p1 = scmp.eq.s32.totalorder %s23_s20, 0  ;;  %p34_p2 = scmp.eq.s32.totalorder %s3251_s15, 0 }
   0x9   : > { %p39_p3 = scmp.ne.s32.totalorder %s3243_s13, %s3239_s12  ;;  %p40_p4 = scmp.eq.s32.totalorder %s3299_s16, 0 }
   0xa   : > { %s3315_s21 = scalar_select %p24_p1, %s3247_s14, %s26_s19  }
   0xb   : > { %p3317_p5 = por %p34_p2, %p33_p0  ;;  %p3321_p6 = por %p40_p4, %p39_p3 }
   0xc   : > { %p105_p7 = scmp.eq.s32.totalorder %s3299_s16, 1  ;;  %p111_p8 = scmp.eq.s32.totalorder %s2931_s17, 1 }
   0xd   : > { %p2979_p10 = scmp.lt.s32.totalorder %s3251_s15, 2  ;;  %s137_s26 = sand.u32 1, %s3247_s14  }
   0xe   : > { %p3328_p11 = por %p105_p7, %p33_p0  ;;  %p3332_p12 = por %p111_p8, %p39_p3 }
   0xf   : > { %s2964_s27 = sshll.u32 %s3251_s15, 8  ;;  %s2934_s28 = sshll.u32 %s137_s26, 8 }
  0x10   : > { %s147_s4 = scalar_lea.hbm %s5162_s0, %s2964_s27  ;;  %s141_s6 = scalar_lea.vmem [#allocation2], %s2934_s28 }
  0x11   : > { %s148_s5 = sshll.u32 %s147_s4, 4  ;;  %s150_s7 = sshll.u32 %s141_s6, 4  ;;  %s149_s5 = int_to_ptr.hbm [resolvable:$true] %s148_s5  ;;  %s151_s7 = int_to_ptr.vmem [resolvable:$true] %s150_s7 }
  0x12   : > { %p3343_p13 = pnand %p2979_p10, %p3317_p5  ;;  %p2938_p0 = scmp.ge.s32.totalorder %s3251_s15, 1 }
  0x13   : > { %p158_p1 = scmp.lt.s32.totalorder %s3251_s15, 3  ;;  %s138_s9 = scalar_lea.sflag [#allocation3], %s137_s26 }
  0x14   : > { %s3155_s10 = sshra.s32 %s149_s5, 4  ;;  %p3159_p3 = pneg %p3343_p13  ;;  %s3156_s10 = int_to_ptr.hbm [resolvable:$true] %s3155_s10 }
  0x15   : > { %s3157_s11 = scalar_lea.hbm %s3156_s10, 256  ;;  %s3162_s20 = scalar_lea.hbm %s5162_s0, 512 }
  0x16   : > { %p3158_p2 = scmp.ne.s32.totalorder %s3156_s10, %s3157_s11  ;;  %p3163_p5 = scmp.lt.s32.totalorder %s3156_s10, %s5162_s0 }
  0x17   : > { %p3164_p8 = scmp.lt.s32.totalorder %s3162_s20, %s3157_s11 }
  0x18   : > { %p3160_p4 = pnand %p3159_p3, %p3158_p2 }
  0x19   : > { %p3165_p10 = por %p3164_p8, %p3163_p5 }
  0x1a   : > { %p3161_p7 = pneg %p3160_p4 }
  0x1c   : > { %p3166_p9 = pnand %p3165_p10, %p3161_p7 }
  0x1e   : > { %3169 = shalt.err (!%p3166_p9)
}
  0x1f   : > { %s3253_s26 = smov 256   ;;  %s3254_s28 = smov 16  }
  0x20   : > { %2974 = dma.hbm_to_vmem [thread:$0]  (!%p3343_p13), %s149_s5, 4096, %s151_s7, %s138_s9, %s3253_s26, %s3253_s26, %s3254_s28  }
  0x21   : > { %p159_p2 = pnand %p2938_p0, %p158_p1 }
  0x23   : > { %162 = sbr.rel (%p159_p2) target bundleno = 1394 (0x572), region = 32 }
  0x28   : > { %s3364_s29 = sand.u32 1, %s3243_s13  }
  0x29   : > { %s2939_s30 = sshll.u32 %s3364_s29, 8  ;;  %s165_s4 = scalar_lea.sflag [#allocation3], %s3364_s29 }
  0x2a   : > { %s3370_s6 = scalar_lea.vmem [#allocation2], %s2939_s30 }
  0x2b   : > { %3230 = dma.done.wait (%p3321_p6), %s165_s4, 4096  }
  0x2c   : > { %3232 = vsyncadd (%p3321_p6), %s165_s4, 4294963200  ;;  %v202_v0 = vld [vmem:[%s3370_s6 + $0x40] sm:$0xff]  ;;  %v203_v1 = vld [vmem:[%s3370_s6 + $0x48] sm:$0xff]  ;;  %v293_v21 = vlaneseq  ;;  %vm845_vm0 = vcmask 130112   ;;  %vm849_vm1 = vcmask 195712   ;;  %vm853_vm2 = vcmask 261312  }
  0x2d   : > { %v198_v2 = vld [vmem:[%s3370_s6 + $0x20] sm:$0xff]  ;;  %v238_v3 = vadd.f32 %v203_v1, %v202_v0  ;;  %v199_v4 = vld [vmem:[%s3370_s6 + $0x28] sm:$0xff]  ;;  %v204_v9 = vld [vmem:[%s3370_s6 + $0x50] sm:$0xff]  ;;  %vm857_vm3 = vcmask 326912   ;;  %vm861_vm4 = vcmask 392512   ;;  %vm865_vm5 = vcmask 458112  }
  0x2e   : > { %v194_v5 = vld [vmem:[%s3370_s6] sm:$0xff]  ;;  %v195_v6 = vld [vmem:[%s3370_s6 + $0x8] sm:$0xff]  ;;  %v232_v7 = vadd.f32 %v199_v4, %v198_v2  ;;  %v205_v10 = vld [vmem:[%s3370_s6 + $0x58] sm:$0xff]  ;;  %v3395_v25 = vshrl.u32 %v293_v21, 7  ;;  %vm869_vm6 = vcmask 523712   ;;  %vm976_vm7 = vcmask 1041409  }
  0x2f   : > { %v226_v8 = vadd.f32 %v195_v6, %v194_v5  ;;  %239 = vadd.xlane.f32.xlu2 %v238_v3  ;;  %v200_v11 = vld [vmem:[%s3370_s6 + $0x30] sm:$0xff]  ;;  %v201_v12 = vld [vmem:[%s3370_s6 + $0x38] sm:$0xff]  ;;  %v241_v15 = vadd.f32 %v205_v10, %v204_v9  ;;  %v210_v18 = vld [vmem:[%s3370_s6 + $0x80] sm:$0xff]  ;;  %v3255_v6 = vmov 0   ;;  %vm978_vm8 = vcmask 1042434   ;;  %s5011_s8 = scalar_lea.vmem [#allocation5], %s2939_s30 }
  0x30   : > { %233 = vadd.xlane.f32.xlu1 %v232_v7  ;;  %v196_v13 = vld [vmem:[%s3370_s6 + $0x10] sm:$0xff]  ;;  %v197_v14 = vld [vmem:[%s3370_s6 + $0x18] sm:$0xff]  ;;  %v235_v16 = vadd.f32 %v201_v12, %v200_v11  ;;  %v211_v19 = vld [vmem:[%s3370_s6 + $0x88] sm:$0xff]  ;;  %v3398_v29 = vadd.s32 8, %v3395_v25  ;;  %v3402_v30 = vadd.s32 16, %v3395_v25  ;;  %v3424_v54 = vadd.s32 24, %v3395_v25 }
  0x31   : > { %227 = vadd.xlane.f32.xlu0 %v226_v8  ;;  %v229_v17 = vadd.f32 %v197_v14, %v196_v13  ;;  %v208_v20 = vld [vmem:[%s3370_s6 + $0x70] sm:$0xff]  ;;  %v209_v22 = vld [vmem:[%s3370_s6 + $0x78] sm:$0xff]  ;;  %v206_v23 = vld [vmem:[%s3370_s6 + $0x60] sm:$0xff]  ;;  %v250_v26 = vadd.f32 %v211_v19, %v210_v18  ;;  %3018 = vset.pattern.permute.xlu1 %v3395_v25  ;;  %v3427_v55 = vadd.s32 32, %v3395_v25  ;;  %v325_v57 = vadd.s32 40, %v3395_v25  ;;  %s2966_s30 = sshll.u32 %s3299_s16, 8 }
  0x32   : > { %v207_v24 = vld [vmem:[%s3370_s6 + $0x68] sm:$0xff]  ;;  %v247_v27 = vadd.f32 %v209_v22, %v208_v20  ;;  %3019 = vset.pattern.permute.xlu2 %v3398_v29  ;;  %3020 = vset.pattern.permute.xlu0 %v3402_v30  ;;  %v216_v31 = vld [vmem:[%s3370_s6 + $0xb0] sm:$0xff]  ;;  %v217_v32 = vld [vmem:[%s3370_s6 + $0xb8] sm:$0xff]  ;;  %v3434_v58 = vadd.s32 48, %v3395_v25  ;;  %v3439_v59 = vadd.s32 56, %v3395_v25  ;;  %vm980_vm9 = vcmask 1043459   ;;  %s2854_s11 = scalar_lea.hbm %s5165_s3, %s2966_s30 }
  0x33   : > { %v244_v28 = vadd.f32 %v207_v24, %v206_v23  ;;  %v214_v33 = vld [vmem:[%s3370_s6 + $0xa0] sm:$0xff]  ;;  %v215_v34 = vld [vmem:[%s3370_s6 + $0xa8] sm:$0xff]  ;;  %v212_v35 = vld [vmem:[%s3370_s6 + $0x90] sm:$0xff]  ;;  %v259_v37 = vadd.f32 %v217_v32, %v216_v31  ;;  %vm987_vm10 = vcmask 519168   ;;  %vm2295_vm11 = vcmask 1044484   ;;  %s2855_s17 = sshll.u32 %s5011_s8, 4  ;;  %s2856_s17 = int_to_ptr.vmem [resolvable:$true] %s2855_s17 }
  0x34   : > { %v213_v36 = vld [vmem:[%s3370_s6 + $0x98] sm:$0xff]  ;;  %v256_v38 = vadd.f32 %v215_v34, %v214_v33  ;;  %v222_v40 = vld [vmem:[%s3370_s6 + $0xe0] sm:$0xff]  ;;  %v223_v41 = vld [vmem:[%s3370_s6 + $0xe8] sm:$0xff]  ;;  %vm2297_vm12 = vcmask 1045509   ;;  %vm2299_vm13 = vcmask 1046534   ;;  %vm2301_vm14 = vcmask 1047559  }
  0x35   : > { %v253_v39 = vadd.f32 %v213_v36, %v212_v35  ;;  %v220_v42 = vld [vmem:[%s3370_s6 + $0xd0] sm:$0xff]  ;;  %v221_v43 = vld [vmem:[%s3370_s6 + $0xd8] sm:$0xff]  ;;  %v218_v44 = vld [vmem:[%s3370_s6 + $0xc0] sm:$0xff]  ;;  %v268_v46 = vadd.f32 %v223_v41, %v222_v40  ;;  %vm2424_vm15 = vcmask 31744   ;;  %s2857_s16 = sshll.u32 %s2854_s11, 4  ;;  %s2842_s19 = scalar_lea.sflag [#allocation4], %s3364_s29  ;;  %s2858_s16 = int_to_ptr.hbm [resolvable:$true] %s2857_s16 }
  0x36   : > { %v219_v45 = vld [vmem:[%s3370_s6 + $0xc8] sm:$0xff]  ;;  %v265_v47 = vadd.f32 %v221_v43, %v220_v42  ;;  %v224_v49 = vld [vmem:[%s3370_s6 + $0xf0] sm:$0xff]  ;;  %v225_v50 = vld [vmem:[%s3370_s6 + $0xf8] sm:$0xff]  ;;  %s3199_s20 = sshra.s32 %s2858_s16, 4  ;;  %s3205_s28 = scalar_lea.hbm %s5165_s3, 512  ;;  %s3200_s20 = int_to_ptr.hbm [resolvable:$true] %s3199_s20 }
  0x37   : > { %242 = vadd.xlane.f32.xlu2 %v241_v15  ;;  %v262_v48 = vadd.f32 %v219_v45, %v218_v44  ;;  %v271_v51 = vadd.f32 %v225_v50, %v224_v49  ;;  %v290_v52 = vld [vmem:[%s5163_s1] sm:$0xf]  ;;  %s3201_s22 = scalar_lea.hbm %s3200_s20, 256  ;;  %p3206_p0 = scmp.lt.s32.totalorder %s3200_s20, %s5165_s3 }
  0x38   : > { %236 = vadd.xlane.f32.xlu1 %v235_v16  ;;  %v292_v53 = vperm.slane %v290_v52, 0  ;;  %v341_v56 = vperm.slane %v290_v52, 1  ;;  %v390_v60 = vperm.slane %v290_v52, 2  ;;  %v3451_v63 = vperm.slane %v290_v52, 3  ;;  %p3202_p6 = scmp.ne.s32.totalorder %s3200_s20, %s3201_s22  ;;  %p3207_p1 = scmp.lt.s32.totalorder %s3205_s28, %s3201_s22 }
  0x39   : > { %230 = vadd.xlane.f32.xlu0 %v229_v17 }
  0x3a   : > { %p3203_p9 = pnand %p3202_p6, %p3328_p11  ;;  %p3208_p3 = por %p3207_p1, %p3206_p0 }
  0x3c   : > { %p3204_p13 = pneg %p3203_p9 }
  0x3e   : > { %p3209_p4 = pnand %p3208_p3, %p3204_p13 }
  0x3f   : > { %251 = vadd.xlane.f32.xlu2 %v250_v26 }
  0x40   : > { %248 = vadd.xlane.f32.xlu1 %v247_v27 }
  0x41   : > { %245 = vadd.xlane.f32.xlu0 %v244_v28 }
  0x47   : > { %260 = vadd.xlane.f32.xlu2 %v259_v37 }
  0x48   : > { %257 = vadd.xlane.f32.xlu1 %v256_v38 }
  0x49   : > { %254 = vadd.xlane.f32.xlu0 %v253_v39 }
  0x4f   : > { %269 = vadd.xlane.f32.xlu2 %v268_v46 }
  0x50   : > { %266 = vadd.xlane.f32.xlu1 %v265_v47 }
  0x51   : > { %263 = vadd.xlane.f32.xlu0 %v262_v48 }
  0x59   : > { %272 = vadd.xlane.f32.xlu0 %v271_v51 }
  0x67   : > { %303 = vperm.xlu2 %3019, %v292_v53  }
  0x69   : > { %297 = vperm.xlu1 %3018, %v292_v53  }
  0x6d   : > { %309 = vperm.xlu0 %3020, %v292_v53  }
  0x6f   : > { %3021 = vset.pattern.permute.xlu2 %v3424_v54 }
  0x71   : > { %3022 = vset.pattern.permute.xlu1 %v3427_v55 }
  0x75   : > { %3027 = vset.pattern.permute.xlu0 %v3398_v29 }
  0x77   : > { %315 = vperm.xlu2 %3021, %v292_v53  }
  0x79   : > { %321 = vperm.xlu1 %3022, %v292_v53  }
  0x7d   : > { %352 = vperm.xlu0 %3027, %v341_v56  }
  0x7f   : > { %3023 = vset.pattern.permute.xlu2 %v325_v57 }
  0x81   : > { %3024 = vset.pattern.permute.xlu1 %v3434_v58 }
  0x85   : > { %3032 = vset.pattern.permute.xlu0 %v3434_v58 }
  0x87   : > { %327 = vperm.xlu2 %3023, %v292_v53  }
  0x89   : > { %333 = vperm.xlu1 %3024, %v292_v53  }
  0x8d   : > { %382 = vperm.xlu0 %3032, %v341_v56  }
  0x8f   : > { %3025 = vset.pattern.permute.xlu2 %v3439_v59 }
  0x91   : > { %3026 = vset.pattern.permute.xlu1 %v3395_v25 }
  0x95   : > { %3037 = vset.pattern.permute.xlu0 %v3424_v54 }
  0x97   : > { %339 = vperm.xlu2 %3025, %v292_v53  }
  0x99   : > { %346 = vperm.xlu1 %3026, %v341_v56  }
  0x9d   : > { %413 = vperm.xlu0 %3037, %v390_v60  }
  0x9f   : > { %3028 = vset.pattern.permute.xlu2 %v3402_v30 }
  0xa1   : > { %3029 = vset.pattern.permute.xlu1 %v3424_v54 }
  0xa2   : > { %v3449_v62 = vpop.xlane.xlu2 %239 }
  0xa3   : > { %v234_v9 = vpop.xlane.xlu1 %233  ;;  %v3551_v43 = vmul.f32 0.00390625, %v3449_v62 }
  0xa4   : > { %v3446_v61 = vpop.xlane.xlu0 %227  ;;  %v3481_v12 = vmul.f32 0.00390625, %v234_v9 }
  0xa5   : > { %3042 = vset.pattern.permute.xlu0 %v3395_v25  ;;  %v3534_v34 = vmul.f32 0.00390625, %v3446_v61 }
  0xa7   : > { %358 = vperm.xlu2 %3028, %v341_v56  }
  0xa9   : > { %364 = vperm.xlu1 %3029, %v341_v56  }
  0xaa   : > { %v3456_v1 = vpop.xlane.xlu2 %242 }
  0xab   : > { %v237_v13 = vpop.xlane.xlu1 %236  ;;  %v3531_v33 = vmul.f32 0.00390625, %v3456_v1 }
  0xac   : > { %v3454_v0 = vpop.xlane.xlu0 %230  ;;  %v277_v42 = vmul.f32 0.00390625, %v237_v13 }
  0xad   : > { %444 = vperm.xlu0 %3042, %v3451_v63   ;;  %v275_v36 = vmul.f32 0.00390625, %v3454_v0 }
  0xaf   : > { %3030 = vset.pattern.permute.xlu2 %v3427_v55 }
  0xb1   : > { %3031 = vset.pattern.permute.xlu1 %v325_v57 }
  0xb2   : > { %v3461_v3 = vpop.xlane.xlu2 %251 }
  0xb3   : > { %v249_v17 = vpop.xlane.xlu1 %248 }
  0xb4   : > { %v3459_v2 = vpop.xlane.xlu0 %245  ;;  %v3493_v19 = vmul.f32 0.00390625, %v249_v17 }
  0xb5   : > { %3047 = vset.pattern.permute.xlu0 %v325_v57  ;;  %v280_v49 = vmul.f32 0.00390625, %v3459_v2 }
  0xb7   : > { %370 = vperm.xlu2 %3030, %v341_v56  }
  0xb9   : > { %376 = vperm.xlu1 %3031, %v341_v56  }
  0xba   : > { %v3468_v5 = vpop.xlane.xlu2 %260 }
  0xbb   : > { %v3495_v20 = vpop.xlane.xlu1 %257 }
  0xbc   : > { %v3465_v4 = vpop.xlane.xlu0 %254 }
  0xbd   : > { %474 = vperm.xlu0 %3047, %v3451_v63  }
  0xbf   : > { %3033 = vset.pattern.permute.xlu2 %v3439_v59 }
  0xc1   : > { %3034 = vset.pattern.permute.xlu1 %v3395_v25 }
  0xc2   : > { %v3473_v8 = vpop.xlane.xlu2 %269 }
  0xc3   : > { %v3502_v24 = vpop.xlane.xlu1 %266 }
  0xc4   : > { %v3471_v7 = vpop.xlane.xlu0 %263 }
  0xc5   : > { %3052 = vset.pattern.permute.xlu0 %v3255_v6 }
  0xc7   : > { %388 = vperm.xlu2 %3033, %v341_v56  }
  0xc9   : > { %395 = vperm.xlu1 %3034, %v390_v60  }
  0xca   : > { %v3479_v11 = vpop.permute.xlu2 %303 }
  0xcb   : > { %v521_v40 = vmul.f32 %v3479_v11, %v275_v36 }
  0xcc   : > { %v3477_v10 = vpop.xlane.xlu0 %272 }
  0xcf   : > { %3035 = vset.pattern.permute.xlu2 %v3398_v29 }
  0xd1   : > { %3036 = vset.pattern.permute.xlu1 %v3402_v30 }
  0xd2   : > { %v3488_v16 = vpop.permute.xlu2 %315 }
  0xd3   : > { %v523_v44 = vmul.f32 %v3488_v16, %v277_v42 }
  0xd7   : > { %401 = vperm.xlu2 %3035, %v390_v60  }
  0xd9   : > { %407 = vperm.xlu1 %3036, %v390_v60  }
  0xdb   : > { %v3510_v28 = vpop.permute.xlu1 %297 }
  0xdc   : > { %v520_v38 = vmul.f32 %v3510_v28, %v3534_v34 }
  0xdf   : > { %v3483_v14 = vpop.permute.xlu0 %309  ;;  %3038 = vset.pattern.permute.xlu2 %v3427_v55 }
  0xe0   : > { %v522_v15 = vmul.f32 %v3483_v14, %v3481_v12 }
  0xe1   : > { %3039 = vset.pattern.permute.xlu1 %v325_v57  ;;  %v3490_v18 = vpop.permute.xlu2 %327 }
  0xe2   : > { %655 = vperm.xlu0 %3052, %v522_v15   ;;  %v525_v51 = vmul.f32 %v3490_v18, %v3531_v33 }
  0xe7   : > { %419 = vperm.xlu2 %3038, %v390_v60  }
  0xe9   : > { %425 = vperm.xlu1 %3039, %v390_v60  }
  0xeb   : > { %v3514_v31 = vpop.permute.xlu1 %321 }
  0xec   : > { %v524_v45 = vmul.f32 %v3514_v31, %v3551_v43 }
  0xef   : > { %3040 = vset.pattern.permute.xlu2 %v3434_v58  ;;  %v3543_v39 = vpop.permute.xlu0 %352 }
  0xf0   : > { %v529_v57 = vmul.f32 %v3543_v39, %v275_v36 }
  0xf1   : > { %3041 = vset.pattern.permute.xlu1 %v3439_v59  ;;  %v3498_v22 = vpop.permute.xlu2 %339 }
  0xf2   : > { %v527_v23 = vmul.f32 %v3498_v22, %v3493_v19 }
  0xf4   : > { %670 = vperm.xlu0 %3052, %v527_v23  }
  0xf7   : > { %431 = vperm.xlu2 %3040, %v390_v60  }
  0xf9   : > { %437 = vperm.xlu1 %3041, %v390_v60  }
  0xff   : > { %3043 = vset.pattern.permute.xlu2 %v3398_v29  ;;  %v3518_v29 = vpop.permute.xlu1 %333  ;;  %v3556_v46 = vpop.permute.xlu0 %382 }
 0x100   : > { %v526_v52 = vmul.f32 %v3518_v29, %v280_v49 }
 0x101   : > { %3044 = vset.pattern.permute.xlu1 %v3402_v30  ;;  %v3506_v26 = vpop.permute.xlu2 %358 }
 0x102   : > { %v530_v27 = vmul.f32 %v3506_v26, %v3481_v12 }
 0x104   : > { %679 = vperm.xlu0 %3052, %v530_v27  }
 0x107   : > { %450 = vperm.xlu2 %3043, %v3451_v63  }
 0x109   : > { %456 = vperm.xlu1 %3044, %v3451_v63  }
 0x10b   : > { %v3522_v30 = vpop.permute.xlu1 %346 }
 0x10c   : > { %v528_v56 = vmul.f32 %v3522_v30, %v3534_v34 }
 0x10f   : > { %3045 = vset.pattern.permute.xlu2 %v3424_v54  ;;  %v3568_v53 = vpop.permute.xlu0 %413 }
 0x111   : > { %3046 = vset.pattern.permute.xlu1 %v3427_v55  ;;  %v3547_v41 = vpop.permute.xlu2 %370  ;;  %v539_v55 = vmul.f32 %v3568_v53, %v277_v42 }
 0x112   : > { %v532_v60 = vmul.f32 %v3547_v41, %v3551_v43 }
 0x117   : > { %462 = vperm.xlu2 %3045, %v3451_v63  }
 0x119   : > { %468 = vperm.xlu1 %3046, %v3451_v63  }
 0x11b   : > { %v3526_v32 = vpop.permute.xlu1 %364 }
 0x11f   : > { %3048 = vset.pattern.permute.xlu2 %v3434_v58 }
 0x121   : > { %3049 = vset.pattern.permute.xlu1 %v3439_v59  ;;  %v3558_v47 = vpop.permute.xlu2 %388  ;;  %v531_v59 = vmul.f32 %v3526_v32, %v277_v42 }
 0x122   : > { %v535_v0 = vmul.f32 %v3558_v47, %v3493_v19 }
 0x127   : > { %480 = vperm.xlu2 %3048, %v3451_v63  }
 0x129   : > { %486 = vperm.xlu1 %3049, %v3451_v63   ;;  %v534_v63 = vmul.f32 %v3556_v46, %v280_v49 }
 0x12b   : > { %v3536_v35 = vpop.permute.xlu1 %376 }
 0x12c   : > { %v533_v37 = vmul.f32 %v3536_v35, %v3531_v33 }
 0x12e   : > { %688 = vperm.xlu0 %3052, %v533_v37  }
 0x12f   : > { %3050 = vset.pattern.permute.xlu2 %v3255_v6 }
 0x130   : > { %649 = vperm.xlu2 %3050, %v520_v38   ;;  %v3603_v38 = vpop.permute.xlu0 %444 }
 0x131   : > { %3051 = vset.pattern.permute.xlu1 %v3255_v6  ;;  %v3570_v54 = vpop.permute.xlu2 %401 }
 0x132   : > { %652 = vperm.xlu1 %3051, %v521_v40   ;;  %v537_v2 = vmul.f32 %v3570_v54, %v275_v36 }
 0x138   : > { %658 = vperm.xlu2 %3050, %v523_v44  }
 0x13a   : > { %661 = vperm.xlu1 %3051, %v524_v45  }
 0x13b   : > { %v3560_v48 = vpop.permute.xlu1 %395 }
 0x13c   : > { %v536_v50 = vmul.f32 %v3560_v48, %v3534_v34 }
 0x13e   : > { %697 = vperm.xlu0 %3052, %v536_v50  }
 0x140   : > { %664 = vperm.xlu2 %3050, %v525_v51  }
 0x141   : > { %v3576_v58 = vpop.permute.xlu2 %419 }
 0x142   : > { %667 = vperm.xlu1 %3051, %v526_v52   ;;  %v540_v23 = vmul.f32 %v3576_v58, %v3551_v43  ;;  %v3616_v52 = vpop.permute.xlu0 %474 }
 0x146   : > { %706 = vperm.xlu0 %3052, %v539_v55  }
 0x148   : > { %673 = vperm.xlu2 %3050, %v528_v56  }
 0x14a   : > { %676 = vperm.xlu1 %3051, %v529_v57   ;;  %v3624_v57 = vmul.f32 0.00390625, %v3465_v4 }
 0x14b   : > { %v3587_v1 = vpop.permute.xlu1 %407 }
 0x14c   : > { %v538_v9 = vmul.f32 %v3587_v1, %v3481_v12 }
 0x150   : > { %682 = vperm.xlu2 %3050, %v531_v59  }
 0x151   : > { %v3581_v61 = vpop.permute.xlu2 %431 }
 0x152   : > { %v542_v62 = vmul.f32 %v3581_v61, %v280_v49  ;;  %685 = vperm.xlu1 %3051, %v532_v60  }
 0x154   : > { %715 = vperm.xlu0 %3052, %v542_v62   ;;  %v3655_v62 = vmul.f32 0.00390625, %v3473_v8 }
 0x158   : > { %691 = vperm.xlu2 %3050, %v534_v63  }
 0x15a   : > { %694 = vperm.xlu1 %3051, %v535_v0  }
 0x15b   : > { %v3595_v17 = vpop.permute.xlu1 %425 }
 0x15c   : > { %v541_v27 = vmul.f32 %v3595_v17, %v3531_v33 }
 0x160   : > { %700 = vperm.xlu2 %3050, %v537_v2  }
 0x161   : > { %v3592_v13 = vpop.permute.xlu2 %450 }
 0x162   : > { %v545_v15 = vmul.f32 %v3592_v13, %v275_v36  ;;  %703 = vperm.xlu1 %3051, %v538_v9   ;;  %v544_v36 = vmul.f32 %v3603_v38, %v3534_v34  ;;  %v549_v34 = vmul.f32 %v3616_v52, %v3531_v33  ;;  %v3638_v33 = vmul.f32 0.00390625, %v3471_v7 }
 0x164   : > { %724 = vperm.xlu0 %3052, %v545_v15  }
 0x168   : > { %709 = vperm.xlu2 %3050, %v540_v23  }
 0x16a   : > { %712 = vperm.xlu1 %3051, %v541_v27  }
 0x16b   : > { %v3601_v37 = vpop.permute.xlu1 %437 }
 0x16c   : > { %v543_v40 = vmul.f32 %v3601_v37, %v3493_v19 }
 0x170   : > { %718 = vperm.xlu2 %3050, %v543_v40   ;;  %v574_v40 = vmul.f32 %v3581_v61, %v3655_v62 }
 0x171   : > { %v3609_v44 = vpop.permute.xlu2 %462 }
 0x172   : > { %721 = vperm.xlu1 %3051, %v544_v36   ;;  %v547_v45 = vmul.f32 %v3609_v44, %v277_v42  ;;  %v3627_v42 = vmul.f32 0.00390625, %v3461_v3  ;;  %v3643_v3 = vmul.f32 0.00390625, %v3468_v5  ;;  %v3713_v36 = vpop.permute.xlu0 %655 }
 0x174   : > { %v552_v60 = vmul.f32 %v3510_v28, %v3627_v42  ;;  %v555_v28 = vmul.f32 %v3488_v16, %v3643_v3  ;;  %v560_v15 = vmul.f32 %v3522_v30, %v3627_v42  ;;  %v571_v23 = vmul.f32 %v3568_v53, %v3643_v3 }
 0x175   : > { %v563_v27 = vmul.f32 %v3526_v32, %v3643_v3  ;;  %v566_v53 = vmul.f32 %v3556_v46, %v3655_v62  ;;  %v576_v61 = vmul.f32 %v3603_v38, %v3627_v42  ;;  %v569_v46 = vmul.f32 %v3570_v54, %v3624_v57 }
 0x17a   : > { %730 = vperm.xlu1 %3051, %v547_v45  }
 0x17b   : > { %v3612_v50 = vpop.permute.xlu1 %456 }
 0x17c   : > { %v546_v51 = vmul.f32 %v3612_v50, %v3481_v12  ;;  %v553_v12 = vmul.f32 %v3479_v11, %v3624_v57  ;;  %v556_v11 = vmul.f32 %v3514_v31, %v3638_v33  ;;  %v558_v31 = vmul.f32 %v3518_v29, %v3655_v62 }
 0x17d   : > { %v561_v29 = vmul.f32 %v3543_v39, %v3624_v57 }
 0x17e   : > { %727 = vperm.xlu2 %3050, %v546_v51   ;;  %v3723_v51 = vpop.permute.xlu0 %670 }
 0x181   : > { %v3618_v55 = vpop.permute.xlu2 %480 }
 0x182   : > { %v550_v56 = vmul.f32 %v3618_v55, %v280_v49 }
 0x184   : > { %739 = vperm.xlu1 %3051, %v550_v56  }
 0x186   : > { %736 = vperm.xlu2 %3050, %v549_v34  }
 0x18a   : > { %v3640_v4 = vpop.permute.xlu2 %649 }
 0x18b   : > { %v3631_v59 = vpop.permute.xlu1 %468 }
 0x18c   : > { %v548_v49 = vmul.f32 %v3631_v59, %v3551_v43  ;;  %748 = vperm.xlu1 %3051, %v553_v12   ;;  %v3650_v43 = vmul.f32 0.00390625, %v3477_v10  ;;  %v3666_v10 = vmul.f32 0.00390625, %v3495_v20  ;;  %v3735_v12 = vpop.permute.xlu0 %679 }
 0x18e   : > { %733 = vperm.xlu0 %3052, %v548_v49   ;;  %745 = vperm.xlu2 %3050, %v552_v60   ;;  %v559_v5 = vmul.f32 %v3498_v22, %v3650_v43  ;;  %v562_v8 = vmul.f32 %v3506_v26, %v3666_v10  ;;  %v554_v22 = vmul.f32 %v3483_v14, %v3666_v10 }
 0x18f   : > { %v564_v14 = vmul.f32 %v3547_v41, %v3638_v33  ;;  %v579_v60 = vmul.f32 %v3609_v44, %v3643_v3  ;;  %v578_v3 = vmul.f32 %v3612_v50, %v3666_v10 }
 0x192   : > { %v3652_v7 = vpop.permute.xlu2 %658 }
 0x194   : > { %757 = vperm.xlu1 %3051, %v556_v11  }
 0x196   : > { %754 = vperm.xlu2 %3050, %v555_v28  }
 0x19a   : > { %v3670_v0 = vpop.permute.xlu2 %664 }
 0x19b   : > { %v3659_v63 = vpop.permute.xlu1 %486 }
 0x19c   : > { %v551_v16 = vmul.f32 %v3659_v63, %v3493_v19  ;;  %766 = vperm.xlu1 %3051, %v559_v5   ;;  %v3679_v19 = vmul.f32 0.00390625, %v3502_v24  ;;  %v568_v24 = vmul.f32 %v3560_v48, %v3627_v42  ;;  %v570_v48 = vmul.f32 %v3587_v1, %v3666_v10 }
 0x19d   : > { %v577_v1 = vmul.f32 %v3592_v13, %v3624_v57  ;;  %v572_v13 = vmul.f32 %v3576_v58, %v3638_v33  ;;  %v583_v57 = vmul.f32 %v3659_v63, %v3650_v43  ;;  %v582_v58 = vmul.f32 %v3618_v55, %v3655_v62 }
 0x19e   : > { %742 = vperm.xlu0 %3052, %v551_v16   ;;  %763 = vperm.xlu2 %3050, %v558_v31   ;;  %v565_v20 = vmul.f32 %v3536_v35, %v3679_v19  ;;  %v557_v26 = vmul.f32 %v3490_v18, %v3679_v19  ;;  %v567_v35 = vmul.f32 %v3558_v47, %v3650_v43  ;;  %v3781_v16 = vand.u32 127, %v293_v21 }
 0x19f   : > { %v573_v32 = vmul.f32 %v3595_v17, %v3679_v19  ;;  %v580_v17 = vmul.f32 %v3631_v59, %v3638_v33  ;;  %v575_v59 = vmul.f32 %v3601_v37, %v3650_v43  ;;  %v3765_v37 = vld [vmem:[%s5164_s2] sm:$0xff]  ;;  %v581_v43 = vmul.f32 %v3616_v52, %v3679_v19 }
 0x1a0   : > { %v3747_v42 = vpop.permute.xlu0 %688  ;;  %v1012_v28 = vperm.slane %v3765_v37, 0  ;;  %v1019_v5 = vperm.slane %v3765_v37, 1  ;;  %v1026_v52 = vperm.slane %v3765_v37, 2 }
 0x1a2   : > { %v3689_v39 = vpop.permute.xlu2 %673 }
 0x1a4   : > { %v3676_v2 = vpop.permute.xlu1 %652  ;;  %775 = vperm.xlu1 %3051, %v562_v8   ;;  %v3788_v8 = vadd.s32 4294967280, %v3781_v16 }
 0x1a6   : > { %751 = vperm.xlu0 %3052, %v554_v22   ;;  %772 = vperm.xlu2 %3050, %v561_v29   ;;  %v3791_v22 = vadd.s32 4294967288, %v3781_v16 }
 0x1aa   : > { %v3699_v41 = vpop.permute.xlu2 %682 }
 0x1ac   : > { %v3687_v9 = vpop.permute.xlu1 %661  ;;  %784 = vperm.xlu1 %3051, %v565_v20   ;;  %v848_v20 = vperm.slane %v3713_v36, %v3788_v8  ;;  %v3822_v36 = vadd.s32 4294967256, %v3781_v16 }
 0x1ae   : > { %760 = vperm.xlu0 %3052, %v557_v26   ;;  %781 = vperm.xlu2 %3050, %v564_v14  }
 0x1b0   : > { %v698_v33 = vpop.permute.xlu0 %697 }
 0x1b2   : > { %v3709_v47 = vpop.permute.xlu2 %691 }
 0x1b4   : > { %v3697_v18 = vpop.permute.xlu1 %667  ;;  %793 = vperm.xlu1 %3051, %v568_v24   ;;  %v3807_v24 = vadd.s32 4294967272, %v3781_v16 }
 0x1b6   : > { %769 = vperm.xlu0 %3052, %v560_v15   ;;  %790 = vperm.xlu2 %3050, %v567_v35   ;;  %v871_v15 = vperm.slane %v3689_v39, %v3781_v16  ;;  %v844_v35 = vperm.slane %v3676_v2, %v3791_v22  ;;  %v3826_v39 = vadd.s32 4294967264, %v3781_v16 }
 0x1b8   : > { %v707_v50 = vpop.permute.xlu0 %706 }
 0x1ba   : > { %v3725_v56 = vpop.permute.xlu2 %700 }
 0x1bb   : > { %v887_v26 = vperm.slane %v3725_v56, %v3791_v22  ;;  %v3834_v56 = vadd.s32 4294967248, %v3781_v16 }
 0x1bc   : > { %v3707_v30 = vpop.permute.xlu1 %676  ;;  %802 = vperm.xlu1 %3051, %v571_v23  }
 0x1bd   : > { %v872_v19 = vperm.slane %v3707_v30, %v3791_v22  ;;  %v1033_v30 = vperm.slane %v3765_v37, 3 }
 0x1be   : > { %778 = vperm.xlu0 %3052, %v563_v27   ;;  %799 = vperm.xlu2 %3050, %v570_v48   ;;  %v874_v27 = vperm.slane %v3735_v12, %v3788_v8  ;;  %v886_v48 = vperm.slane %v698_v33, %v3781_v16  ;;  %v852_v12 = vperm.slane %v3652_v7, %v3807_v24 }
 0x1bf   : > { %v873_v2 = vsel %vm845_vm0, %v872_v19, %v871_v15 }
 0x1c2   : > { %v3743_v54 = vpop.permute.xlu2 %709 }
 0x1c4   : > { %v3719_v45 = vpop.permute.xlu1 %685  ;;  %811 = vperm.xlu1 %3051, %v574_v40   ;;  %v842_v40 = vperm.slane %v3640_v4, %v3781_v16 }
 0x1c6   : > { %787 = vperm.xlu0 %3052, %v566_v53   ;;  %808 = vperm.xlu2 %3050, %v573_v32   ;;  %v3778_v31 = vpop.permute.xlu0 %715  ;;  %v888_v53 = vsel %vm845_vm0, %v887_v26, %v886_v48  ;;  %v846_v32 = vsel %vm845_vm0, %v844_v35, %v842_v40  ;;  %v882_v35 = vperm.slane %v3709_v47, %v3834_v56 }
 0x1ca   : > { %v3755_v44 = vpop.permute.xlu2 %718 }
 0x1cc   : > { %v3731_v34 = vpop.permute.xlu1 %694  ;;  %820 = vperm.xlu1 %3051, %v577_v1  }
 0x1ce   : > { %796 = vperm.xlu0 %3052, %v569_v46   ;;  %817 = vperm.xlu2 %3050, %v576_v61   ;;  %v891_v61 = vperm.slane %v707_v50, %v3807_v24  ;;  %v875_v46 = vsel %vm849_vm1, %v874_v27, %v873_v2 }
 0x1d4   : > { %v3741_v38 = vpop.permute.xlu1 %703  ;;  %829 = vperm.xlu1 %3051, %v580_v17   ;;  %v878_v17 = vperm.slane %v3719_v45, %v3826_v39 }
 0x1d5   : > { %v889_v23 = vperm.slane %v3741_v38, %v3788_v8 }
 0x1d6   : > { %805 = vperm.xlu0 %3052, %v572_v13   ;;  %826 = vperm.xlu2 %3050, %v579_v60   ;;  %v725_v21 = vpop.permute.xlu0 %724  ;;  %v876_v13 = vperm.slane %v3699_v41, %v3807_v24  ;;  %v893_v41 = vperm.slane %v3743_v54, %v3826_v39  ;;  %v880_v54 = vperm.slane %v3747_v42, %v3822_v36 }
 0x1d7   : > { %v890_v1 = vsel %vm849_vm1, %v889_v23, %v888_v53  ;;  %v902_v60 = vperm.slane %v725_v21, %v3791_v22  ;;  %v864_v21 = vperm.slane %v3697_v18, %v3834_v56 }
 0x1d8   : > { %v3768_v55 = vpop.permute.xlu2 %727  ;;  %v892_v45 = vsel %vm853_vm2, %v891_v61, %v890_v1 }
 0x1d9   : > { %v894_v19 = vsel %vm857_vm3, %v893_v41, %v892_v45 }
 0x1dc   : > { %v3753_v49 = vpop.permute.xlu1 %712  ;;  %838 = vperm.xlu1 %3051, %v583_v57  }
 0x1dd   : > { %v895_v33 = vperm.slane %v3753_v49, %v3822_v36  ;;  %v1040_v49 = vperm.slane %v3765_v37, 4 }
 0x1de   : > { %814 = vperm.xlu0 %3052, %v575_v59   ;;  %835 = vperm.xlu2 %3050, %v582_v58   ;;  %v850_v59 = vsel %vm849_vm1, %v848_v20, %v846_v32  ;;  %v856_v58 = vperm.slane %v3687_v9, %v3826_v39  ;;  %v904_v9 = vperm.slane %v3768_v55, %v3788_v8 }
 0x1df   : > { %v896_v55 = vsel %vm861_vm4, %v895_v33, %v894_v19 }
 0x1e0   : > { %v3776_v63 = vpop.permute.xlu2 %736 }
 0x1e1   : > { %v910_v27 = vperm.slane %v3776_v63, %v3822_v36 }
 0x1e4   : > { %v3759_v11 = vpop.permute.xlu1 %721  ;;  %3053 = vset.pattern.permute.xlu1 %v3395_v25 }
 0x1e5   : > { %v901_v4 = vperm.slane %v3759_v11, %v3781_v16 }
 0x1e6   : > { %823 = vperm.xlu0 %3052, %v578_v3   ;;  %3054 = vset.pattern.permute.xlu2 %v3395_v25  ;;  %v877_v3 = vsel %vm853_vm2, %v876_v13, %v875_v46 }
 0x1e7   : > { %v903_v11 = vsel %vm845_vm0, %v902_v60, %v901_v4  ;;  %v3916_v60 = vld [vmem:[%s5164_s2 + $0x8] sm:$0xff] }
 0x1e8   : > { %v3793_v29 = vpop.permute.xlu2 %745  ;;  %v905_v20 = vsel %vm849_vm1, %v904_v9, %v903_v11  ;;  %v1068_v45 = vperm.slane %v3916_v60, 0  ;;  %v1075_v11 = vperm.slane %v3916_v60, 1 }
 0x1ec   : > { %1017 = vperm.xlu1 %3053, %v1012_v28   ;;  %v3773_v62 = vpop.permute.xlu1 %730 }
 0x1ed   : > { %v906_v28 = vperm.slane %v3773_v62, %v3807_v24 }
 0x1ee   : > { %832 = vperm.xlu0 %3052, %v581_v43   ;;  %v879_v43 = vsel %vm857_vm3, %v878_v17, %v877_v3 }
 0x1ef   : > { %v881_v26 = vsel %vm861_vm4, %v880_v54, %v879_v43  ;;  %v907_v15 = vsel %vm853_vm2, %v906_v28, %v905_v20  ;;  %v3938_v54 = vld [vmem:[%s5164_s2 + $0x10] sm:$0xff] }
 0x1f0   : > { %v3845_v38 = vpop.permute.xlu2 %754 }
 0x1f4   : > { %1024 = vperm.xlu1 %3053, %v1019_v5   ;;  %v860_v5 = vperm.slane %v3670_v0, %v3822_v36  ;;  %v897_v0 = vperm.slane %v3778_v31, %v3834_v56 }
 0x1f6   : > { %v3783_v10 = vpop.permute.xlu1 %739  ;;  %3055 = vset.pattern.permute.xlu0 %v3395_v25  ;;  %v3800_v25 = vadd.s32 4294967240, %v3781_v16  ;;  %v898_v48 = vsel %vm865_vm5, %v897_v0, %v896_v55  ;;  %v1145_v0 = vperm.slane %v3938_v54, 3 }
 0x1f7   : > { %v912_v32 = vperm.slane %v3783_v10, %v3834_v56 }
 0x1f8   : > { %v884_v42 = vperm.slane %v3731_v34, %v3800_v25  ;;  %v899_v34 = vperm.slane %v3755_v44, %v3800_v25  ;;  %v868_v47 = vperm.slane %v3723_v51, %v3800_v25  ;;  %v3899_v53 = vpop.permute.xlu2 %763  ;;  %v1047_v44 = vperm.slane %v3765_v37, 5 }
 0x1fa   : > { %v900_v4 = vsel %vm869_vm6, %v899_v34, %v898_v48  ;;  %v3957_v48 = vld [vmem:[%s5164_s2 + $0x18] sm:$0xff] }
 0x1fb   : > { %v1187_v34 = vperm.slane %v3957_v48, 1 }
 0x1fc   : > { %1031 = vperm.xlu1 %3053, %v1026_v52   ;;  %v854_v52 = vsel %vm853_vm2, %v852_v12, %v850_v59 }
 0x1fd   : > { %v858_v62 = vsel %vm857_vm3, %v856_v58, %v854_v52 }
 0x1fe   : > { %v3804_v14 = vpop.permute.xlu1 %748  ;;  %v862_v18 = vsel %vm861_vm4, %v860_v5, %v858_v62  ;;  %v1124_v62 = vperm.slane %v3938_v54, 0 }
 0x1ff   : > { %v866_v31 = vsel %vm865_vm5, %v864_v21, %v862_v18  ;;  %v1096_v21 = vperm.slane %v3916_v60, 4 }
 0x200   : > { %v734_v57 = vpop.permute.xlu0 %733  ;;  %v870_v51 = vsel %vm869_vm6, %v868_v47, %v866_v31  ;;  %v773_v33 = vpop.permute.xlu2 %772 }
 0x201   : > { %v908_v50 = vperm.slane %v734_v57, %v3826_v39 }
 0x203   : > { %v909_v23 = vsel %vm857_vm3, %v908_v50, %v907_v15  ;;  %v1061_v50 = vperm.slane %v3765_v37, 7 }
 0x204   : > { %1038 = vperm.xlu1 %3053, %v1033_v30   ;;  %v883_v30 = vsel %vm865_vm5, %v882_v35, %v881_v26  ;;  %v911_v63 = vsel %vm861_vm4, %v910_v27, %v909_v23  ;;  %v1166_v35 = vperm.slane %v3938_v54, 6  ;;  %v1131_v23 = vperm.slane %v3938_v54, 1 }
 0x205   : > { %v885_v2 = vsel %vm869_vm6, %v884_v42, %v883_v30  ;;  %v913_v46 = vsel %vm865_vm5, %v912_v32, %v911_v63  ;;  %v1110_v42 = vperm.slane %v3916_v60, 6  ;;  %v1152_v30 = vperm.slane %v3938_v54, 4 }
 0x206   : > { %v3853_v7 = vpop.permute.xlu1 %757  ;;  %v977_v17 = vsel %vm976_vm7, %v885_v2, %v870_v51  ;;  %v932_v51 = vperm.slane %v773_v33, %v3791_v22 }
 0x207   : > { %v979_v13 = vsel %vm978_vm8, %v900_v4, %v977_v17  ;;  %v1173_v4 = vperm.slane %v3938_v54, 7 }
 0x208   : > { %v3929_v28 = vpop.permute.xlu2 %781 }
 0x20c   : > { %1045 = vperm.xlu1 %3053, %v1040_v49   ;;  %v1082_v49 = vperm.slane %v3916_v60, 2 }
 0x20e   : > { %v3894_v40 = vpop.permute.xlu1 %766 }
 0x210   : > { %v743_v1 = vpop.permute.xlu0 %742  ;;  %v3933_v5 = vpop.permute.xlu2 %790 }
 0x211   : > { %v914_v61 = vperm.slane %v743_v1, %v3800_v25 }
 0x213   : > { %v915_v12 = vsel %vm869_vm6, %v914_v61, %v913_v46  ;;  %v917_v61 = vperm.slane %v3804_v14, %v3791_v22 }
 0x214   : > { %1052 = vperm.xlu1 %3053, %v1047_v44   ;;  %v981_v10 = vsel %vm980_vm9, %v915_v12, %v979_v13  ;;  %v1208_v44 = vperm.slane %v3957_v48, 4  ;;  %v916_v12 = vperm.slane %v3793_v29, %v3781_v16 }
 0x215   : > { %v988_v59 = vsel %vm987_vm10, %v981_v10, 0.0 }
 0x216   : > { %v3918_v57 = vpop.permute.xlu1 %775  ;;  %v918_v14 = vsel %vm845_vm0, %v917_v61, %v916_v12 }
 0x218   : > { %989 = vadd.xlane.f32.xlu0 %v988_v59  ;;  %v3921_v58 = vpop.permute.xlu0 %751  ;;  %v800_v55 = vpop.permute.xlu2 %799  ;;  %v934_v59 = vperm.slane %v3918_v57, %v3788_v8 }
 0x219   : > { %v919_v46 = vperm.slane %v3921_v58, %v3788_v8  ;;  %v949_v58 = vperm.slane %v800_v55, %v3788_v8  ;;  %v1229_v55 = vperm.slane %v3957_v48, 7 }
 0x21b   : > { %v920_v29 = vsel %vm849_vm1, %v919_v46, %v918_v14 }
 0x21c   : > { %1073 = vperm.xlu1 %3053, %v1068_v45  }
 0x21e   : > { %v3924_v41 = vpop.permute.xlu1 %784 }
 0x220   : > { %v3926_v3 = vpop.permute.xlu0 %760  ;;  %v3952_v18 = vpop.permute.xlu2 %808 }
 0x224   : > { %1080 = vperm.xlu1 %3053, %v1075_v11   ;;  %v921_v11 = vperm.slane %v3845_v38, %v3807_v24 }
 0x226   : > { %v794_v43 = vpop.permute.xlu1 %793 }
 0x227   : > { %v946_v17 = vperm.slane %v794_v43, %v3781_v16 }
 0x228   : > { %v770_v9 = vpop.permute.xlu0 %769  ;;  %v818_v47 = vpop.permute.xlu2 %817 }
 0x229   : > { %v931_v63 = vperm.slane %v770_v9, %v3781_v16 }
 0x22b   : > { %v933_v13 = vsel %vm845_vm0, %v932_v51, %v931_v63 }
 0x22c   : > { %1066 = vperm.xlu0 %3055, %v1061_v50   ;;  %1087 = vperm.xlu1 %3053, %v1082_v49   ;;  %v935_v43 = vsel %vm849_vm1, %v934_v59, %v933_v13  ;;  %v929_v59 = vperm.slane %v3894_v40, %v3800_v25 }
 0x22e   : > { %v3940_v52 = vpop.permute.xlu1 %802 }
 0x230   : > { %v779_v19 = vpop.permute.xlu0 %778  ;;  %v827_v33 = vpop.permute.xlu2 %826 }
 0x231   : > { %v936_v10 = vperm.slane %v779_v19, %v3807_v24 }
 0x233   : > { %v937_v50 = vsel %vm853_vm2, %v936_v10, %v935_v43 }
 0x234   : > { %1129 = vperm.xlu0 %3055, %v1124_v62   ;;  %1101 = vperm.xlu1 %3053, %v1096_v21   ;;  %v938_v62 = vperm.slane %v3929_v28, %v3826_v39  ;;  %v951_v21 = vperm.slane %v3940_v52, %v3807_v24  ;;  %v923_v28 = vperm.slane %v3853_v7, %v3826_v39 }
 0x236   : > { %v3944_v20 = vpop.permute.xlu1 %811 }
 0x237   : > { %v957_v51 = vperm.slane %v3944_v20, %v3834_v56 }
 0x238   : > { %v3946_v26 = vpop.permute.xlu0 %787  ;;  %v836_v46 = vpop.permute.xlu2 %835 }
 0x239   : > { %v942_v52 = vperm.slane %v3946_v26, %v3834_v56  ;;  %v972_v14 = vperm.slane %v836_v46, %v3834_v56 }
 0x23c   : > { %1150 = vperm.xlu0 %3055, %v1145_v0   ;;  %1115 = vperm.xlu1 %3053, %v1110_v42   ;;  %v1194_v0 = vperm.slane %v3957_v48, 2  ;;  %v922_v42 = vsel %vm853_vm2, %v921_v11, %v920_v29 }
 0x23e   : > { %v821_v27 = vpop.permute.xlu1 %820 }
 0x23f   : > { %v962_v57 = vperm.slane %v821_v27, %v3791_v22 }
 0x240   : > { %v797_v15 = vpop.permute.xlu0 %796 }
 0x241   : > { %v947_v32 = vperm.slane %v797_v15, %v3791_v22  ;;  %v925_v22 = vperm.slane %v3926_v3, %v3822_v36  ;;  %v961_v15 = vperm.slane %v818_v47, %v3781_v16  ;;  %v966_v47 = vperm.slane %v827_v33, %v3807_v24 }
 0x242   : > { %v944_v24 = vperm.slane %v3933_v5, %v3800_v25 }
 0x243   : > { %v948_v45 = vsel %vm845_vm0, %v947_v32, %v946_v17 }
 0x244   : > { %1171 = vperm.xlu0 %3055, %v1166_v35   ;;  %1136 = vperm.xlu1 %3053, %v1131_v23   ;;  %v950_v49 = vsel %vm849_vm1, %v949_v58, %v948_v45  ;;  %v939_v23 = vsel %vm857_vm3, %v938_v62, %v937_v50 }
 0x245   : > { %v952_v27 = vsel %vm853_vm2, %v951_v21, %v950_v49  ;;  %v4067_v49 = vld [vmem:[%s5164_s2 + $0x28] sm:$0xff] }
 0x246   : > { %v3961_v2 = vpop.permute.xlu1 %829  ;;  %v1292_v62 = vperm.slane %v4067_v49, 0 }
 0x247   : > { %v968_v12 = vperm.slane %v3961_v2, %v3826_v39 }
 0x248   : > { %v806_v31 = vpop.permute.xlu0 %805 }
 0x249   : > { %v953_v19 = vperm.slane %v806_v31, %v3826_v39  ;;  %v940_v31 = vperm.slane %v3924_v41, %v3822_v36  ;;  %v4023_v41 = vld [vmem:[%s5164_s2 + $0x20] sm:$0xff] }
 0x24a   : > { %v1250_v10 = vperm.slane %v4023_v41, 2  ;;  %v1257_v21 = vperm.slane %v4023_v41, 3 }
 0x24b   : > { %v954_v3 = vsel %vm857_vm3, %v953_v19, %v952_v27  ;;  %v941_v63 = vsel %vm861_vm4, %v940_v31, %v939_v23  ;;  %v4086_v23 = vld [vmem:[%s5164_s2 + $0x30] sm:$0xff]  ;;  %v1320_v27 = vperm.slane %v4067_v49, 4  ;;  %v1103_v31 = vperm.slane %v3916_v60, 5 }
 0x24c   : > { %1192 = vperm.xlu0 %3055, %v1187_v34   ;;  %1157 = vperm.xlu1 %3053, %v1152_v30   ;;  %v963_v34 = vsel %vm845_vm0, %v962_v57, %v961_v15  ;;  %v924_v30 = vsel %vm857_vm3, %v923_v28, %v922_v42  ;;  %v943_v32 = vsel %vm865_vm5, %v942_v52, %v941_v63  ;;  %v1236_v57 = vperm.slane %v4023_v41, 0 }
 0x24d   : > { %v926_v26 = vsel %vm861_vm4, %v925_v22, %v924_v30  ;;  %v945_v20 = vsel %vm869_vm6, %v944_v24, %v943_v32  ;;  %v1054_v42 = vperm.slane %v3765_v37, 6  ;;  %v1334_v15 = vperm.slane %v4067_v49, 6  ;;  %v4106_v32 = vld [vmem:[%s5164_s2 + $0x38] sm:$0xff] }
 0x24e   : > { %v839_v9 = vpop.permute.xlu1 %838  ;;  %v1089_v28 = vperm.slane %v3916_v60, 3  ;;  %v1355_v37 = vperm.slane %v4086_v23, 1  ;;  %v1117_v30 = vperm.slane %v3916_v60, 7  ;;  %v1362_v63 = vperm.slane %v4086_v23, 2 }
 0x24f   : > { %v974_v2 = vperm.slane %v839_v9, %v3800_v25  ;;  %v1271_v9 = vperm.slane %v4023_v41, 5  ;;  %v1383_v24 = vperm.slane %v4086_v23, 5 }
 0x250   : > { %v3965_v1 = vpop.permute.xlu0 %814 }
 0x254   : > { %1213 = vperm.xlu0 %3055, %v1208_v44   ;;  %1178 = vperm.xlu1 %3053, %v1173_v4   ;;  %v959_v4 = vperm.slane %v3965_v1, %v3800_v25  ;;  %v1215_v1 = vperm.slane %v3957_v48, 5 }
 0x258   : > { %v824_v38 = vpop.permute.xlu0 %823 }
 0x259   : > { %v964_v35 = vperm.slane %v824_v38, %v3788_v8  ;;  %v955_v8 = vperm.slane %v3952_v18, %v3822_v36  ;;  %v927_v18 = vperm.slane %v3899_v53, %v3834_v56 }
 0x25b   : > { %v965_v7 = vsel %vm849_vm1, %v964_v35, %v963_v34  ;;  %v956_v44 = vsel %vm861_vm4, %v955_v8, %v954_v3  ;;  %v928_v53 = vsel %vm865_vm5, %v927_v18, %v926_v26  ;;  %v1299_v35 = vperm.slane %v4067_v49, 1 }
 0x25c   : > { %1234 = vperm.xlu0 %3055, %v1229_v55   ;;  %1199 = vperm.xlu1 %3053, %v1194_v0   ;;  %v967_v17 = vsel %vm853_vm2, %v966_v47, %v965_v7  ;;  %v958_v45 = vsel %vm865_vm5, %v957_v51, %v956_v44  ;;  %v930_v11 = vsel %vm869_vm6, %v929_v59, %v928_v53  ;;  %v1313_v55 = vperm.slane %v4067_v49, 3 }
 0x25d   : > { %v969_v58 = vsel %vm857_vm3, %v968_v12, %v967_v17  ;;  %v960_v39 = vsel %vm869_vm6, %v959_v4, %v958_v45  ;;  %v982_v40 = vsel %vm976_vm7, %v945_v20, %v930_v11  ;;  %v1278_v0 = vperm.slane %v4023_v41, 6 }
 0x25e   : > { %v4031_v61 = vpop.permute.xlu1 %1017  ;;  %v983_v56 = vsel %vm978_vm8, %v960_v39, %v982_v40  ;;  %v1376_v3 = vperm.slane %v4086_v23, 4  ;;  %v1341_v8 = vperm.slane %v4067_v49, 7  ;;  %v1397_v47 = vperm.slane %v4086_v23, 7 }
 0x25f   : > { %v1138_v18 = vperm.slane %v3938_v54, 2  ;;  %v1418_v4 = vperm.slane %v4106_v32, 2  ;;  %v1159_v51 = vperm.slane %v3938_v54, 5  ;;  %v1439_v53 = vperm.slane %v4106_v32, 5 }
 0x260   : > { %v833_v13 = vpop.permute.xlu0 %832  ;;  %v1404_v12 = vperm.slane %v4106_v32, 0  ;;  %v1425_v54 = vperm.slane %v4106_v32, 3  ;;  %v1201_v20 = vperm.slane %v3957_v48, 3 }
 0x261   : > { %v970_v5 = vperm.slane %v833_v13, %v3822_v36  ;;  %v1180_v13 = vperm.slane %v3957_v48, 0 }
 0x263   : > { %v971_v33 = vsel %vm861_vm4, %v970_v5, %v969_v58  ;;  %v1446_v58 = vperm.slane %v4106_v32, 6 }
 0x264   : > { %1255 = vperm.xlu0 %3055, %v1250_v10   ;;  %1220 = vperm.xlu1 %3053, %v1215_v1   ;;  %v973_v36 = vsel %vm865_vm5, %v972_v14, %v971_v33 }
 0x265   : > { %v975_v29 = vsel %vm869_vm6, %v974_v2, %v973_v36  ;;  %v1222_v2 = vperm.slane %v3957_v48, 6 }
 0x266   : > { %v4058_v43 = vpop.permute.xlu1 %1024  ;;  %v984_v50 = vsel %vm980_vm9, %v975_v29, %v983_v56  ;;  %v1243_v29 = vperm.slane %v4023_v41, 1 }
 0x267   : > { %v991_v25 = vsel %vm987_vm10, %v984_v50, 0.0 }
 0x268   : > { %992 = vadd.xlane.f32.xlu2 %v991_v25  ;;  %v1264_v25 = vperm.slane %v4023_v41, 4 }
 0x26c   : > { %1276 = vperm.xlu0 %3055, %v1271_v9   ;;  %1241 = vperm.xlu1 %3053, %v1236_v57  }
 0x26e   : > { %v4069_v19 = vpop.permute.xlu1 %1031 }
 0x274   : > { %1297 = vperm.xlu0 %3055, %v1292_v62   ;;  %1262 = vperm.xlu1 %3053, %v1257_v21   ;;  %v1285_v62 = vperm.slane %v4023_v41, 7 }
 0x276   : > { %v4073_v38 = vpop.permute.xlu1 %1038 }
 0x27c   : > { %1318 = vperm.xlu0 %3055, %v1313_v55   ;;  %1283 = vperm.xlu1 %3053, %v1278_v0  }
 0x27e   : > { %v4078_v22 = vpop.permute.xlu1 %1045 }
 0x280   : > { %1059 = vperm.xlu2 %3054, %v1054_v42   ;;  %v1306_v42 = vperm.slane %v4067_v49, 2 }
 0x284   : > { %1339 = vperm.xlu0 %3055, %v1334_v15   ;;  %1304 = vperm.xlu1 %3053, %v1299_v35  }
 0x286   : > { %v4088_v52 = vpop.permute.xlu1 %1052 }
 0x288   : > { %1094 = vperm.xlu2 %3054, %v1089_v28  }
 0x28b   : > { %v990_v7 = vpop.xlane.xlu0 %989 }
 0x28c   : > { %1360 = vperm.xlu0 %3055, %v1355_v37   ;;  %1325 = vperm.xlu1 %3053, %v1320_v27   ;;  %v4126_v59 = vmax.f32 %v990_v7, 0.0  ;;  %v1327_v37 = vperm.slane %v4067_v49, 5 }
 0x28e   : > { %v4093_v34 = vpop.permute.xlu1 %1073  ;;  %v1524_v5 = vmul.f32 %v4031_v61, %v4126_v59  ;;  %v1529_v39 = vmul.f32 %v4088_v52, %v4126_v59  ;;  %v1525_v36 = vmul.f32 %v4058_v43, %v4126_v59  ;;  %v1527_v50 = vmul.f32 %v4073_v38, %v4126_v59 }
 0x28f   : > { %v1532_v40 = vmul.f32 %v4093_v34, %v4126_v59 }
 0x290   : > { %1108 = vperm.xlu2 %3054, %v1103_v31  }
 0x294   : > { %1381 = vperm.xlu0 %3055, %v1376_v3   ;;  %1346 = vperm.xlu1 %3053, %v1341_v8  }
 0x296   : > { %v4098_v26 = vpop.permute.xlu1 %1080 }
 0x297   : > { %v1533_v7 = vmul.f32 %v4098_v26, %v4126_v59 }
 0x298   : > { %1122 = vperm.xlu2 %3054, %v1117_v30   ;;  %v1348_v30 = vperm.slane %v4086_v23, 0 }
 0x29c   : > { %1402 = vperm.xlu0 %3055, %v1397_v47   ;;  %1367 = vperm.xlu1 %3053, %v1362_v63  }
 0x29e   : > { %v4108_v44 = vpop.permute.xlu0 %1066  ;;  %v4110_v60 = vpop.permute.xlu1 %1087 }
 0x2a0   : > { %1143 = vperm.xlu2 %3054, %v1138_v18  }
 0x2a4   : > { %1423 = vperm.xlu0 %3055, %v1418_v4   ;;  %1388 = vperm.xlu1 %3053, %v1383_v24   ;;  %v1369_v4 = vperm.slane %v4086_v23, 3 }
 0x2a6   : > { %v4115_v46 = vpop.permute.xlu0 %1129  ;;  %v4117_v17 = vpop.permute.xlu1 %1101 }
 0x2a7   : > { %v1536_v24 = vmul.f32 %v4117_v17, %v4126_v59 }
 0x2a8   : > { %1164 = vperm.xlu2 %3054, %v1159_v51  }
 0x2ac   : > { %1444 = vperm.xlu0 %3055, %v1439_v53   ;;  %1409 = vperm.xlu1 %3053, %v1404_v12  }
 0x2ae   : > { %v4122_v10 = vpop.permute.xlu0 %1150  ;;  %v4124_v1 = vpop.permute.xlu1 %1115 }
 0x2af   : > { %v1538_v18 = vmul.f32 %v4124_v1, %v4126_v59 }
 0x2b0   : > { %1185 = vperm.xlu2 %3054, %v1180_v13  }
 0x2b4   : > { %3056 = vset.pattern.permute.xlu0 %v3255_v6  ;;  %1430 = vperm.xlu1 %3053, %v1425_v54  }
 0x2b5   : > { %1781 = vperm.xlu0 %3056, %v1524_v5   ;;  %v1390_v5 = vperm.slane %v4086_v23, 6 }
 0x2b6   : > { %v4133_v45 = vpop.permute.xlu0 %1171  ;;  %v4135_v14 = vpop.permute.xlu1 %1136 }
 0x2b7   : > { %v1541_v13 = vmul.f32 %v4135_v14, %v4126_v59 }
 0x2b8   : > { %1206 = vperm.xlu2 %3054, %v1201_v20  }
 0x2bc   : > { %1451 = vperm.xlu1 %3053, %v1446_v58  }
 0x2bd   : > { %1796 = vperm.xlu0 %3056, %v1529_v39  }
 0x2be   : > { %v4141_v33 = vpop.permute.xlu0 %1192  ;;  %v4143_v11 = vpop.permute.xlu1 %1157 }
 0x2c0   : > { %1227 = vperm.xlu2 %3054, %v1222_v2   ;;  %v1544_v2 = vmul.f32 %v4143_v11, %v4126_v59 }
 0x2c4   : > { %3057 = vset.pattern.permute.xlu1 %v3255_v6 }
 0x2c5   : > { %1805 = vperm.xlu0 %3056, %v1532_v40   ;;  %1784 = vperm.xlu1 %3057, %v1525_v36   ;;  %v1411_v40 = vperm.slane %v4106_v32, 1 }
 0x2c6   : > { %v4151_v56 = vpop.permute.xlu0 %1213  ;;  %v4153_v48 = vpop.permute.xlu1 %1178 }
 0x2c8   : > { %1248 = vperm.xlu2 %3054, %v1243_v29  }
 0x2cd   : > { %1790 = vperm.xlu1 %3057, %v1527_v50   ;;  %v1547_v50 = vmul.f32 %v4153_v48, %v4126_v59 }
 0x2ce   : > { %v4158_v9 = vpop.permute.xlu0 %1234  ;;  %v4160_v57 = vpop.permute.xlu1 %1199 }
 0x2d0   : > { %1269 = vperm.xlu2 %3054, %v1264_v25  }
 0x2d6   : > { %v4163_v21 = vpop.permute.xlu0 %1255  ;;  %v4165_v55 = vpop.permute.xlu1 %1220 }
 0x2d8   : > { %1290 = vperm.xlu2 %3054, %v1285_v62   ;;  %v1432_v62 = vperm.slane %v4106_v32, 4 }
 0x2db   : > { %v4167_v0 = vpop.xlane.xlu2 %992 }
 0x2de   : > { %v4170_v15 = vpop.permute.xlu0 %1276  ;;  %v4172_v35 = vpop.permute.xlu1 %1241 }
 0x2e0   : > { %1311 = vperm.xlu2 %3054, %v1306_v42  }
 0x2e3   : > { %v4174_v28 = vpop.permute.xlu2 %1059 }
 0x2e4   : > { %v1530_v41 = vmul.f32 %v4174_v28, %v4126_v59 }
 0x2e6   : > { %v4179_v27 = vpop.permute.xlu0 %1297  ;;  %v4181_v31 = vpop.permute.xlu1 %1262  ;;  %1799 = vperm.xlu1 %3057, %v1530_v41  }
 0x2e8   : > { %1332 = vperm.xlu2 %3054, %v1327_v37  }
 0x2eb   : > { %v4183_v3 = vpop.permute.xlu2 %1094 }
 0x2ec   : > { %v1535_v8 = vmul.f32 %v4183_v3, %v4126_v59 }
 0x2ee   : > { %1814 = vperm.xlu0 %3056, %v1535_v8   ;;  %v4190_v49 = vpop.permute.xlu1 %1283  ;;  %1808 = vperm.xlu1 %3057, %v1533_v7   ;;  %v4192_v47 = vpop.permute.xlu0 %1318  ;;  %v1550_v8 = vmul.f32 %v4160_v57, %v4126_v59  ;;  %v1453_v7 = vperm.slane %v4106_v32, 7  ;;  %v1526_v32 = vmul.f32 %v4069_v19, %v4126_v59 }
 0x2f0   : > { %1353 = vperm.xlu2 %3054, %v1348_v30  }
 0x2f3   : > { %v4194_v63 = vpop.permute.xlu2 %1108 }
 0x2f6   : > { %1823 = vperm.xlu0 %3056, %v1538_v18   ;;  %v4201_v51 = vpop.permute.xlu1 %1304  ;;  %1817 = vperm.xlu1 %3057, %v1536_v24   ;;  %v4203_v53 = vpop.permute.xlu0 %1339 }
 0x2f7   : > { %5196 = vst [vmem:[#allocation8_spill] sm:$0xff] %v4201_v51 }
 0x2f8   : > { %1374 = vperm.xlu2 %3054, %v1369_v4  }
 0x2fb   : > { %v4205_v12 = vpop.permute.xlu2 %1122 }
 0x2fc   : > { %5197 = vst [vmem:[#allocation9_spill] sm:$0xff] %v4205_v12  ;;  %v1539_v54 = vmul.f32 %v4205_v12, %v4126_v59 }
 0x2fe   : > { %1832 = vperm.xlu0 %3056, %v1541_v13   ;;  %v4212_v20 = vpop.permute.xlu1 %1325  ;;  %1826 = vperm.xlu1 %3057, %v1539_v54   ;;  %v4214_v58 = vpop.permute.xlu0 %1360  ;;  %v1553_v13 = vmul.f32 %v4165_v55, %v4126_v59 }
 0x2ff   : > { %5198 = vst [vmem:[#allocation10_spill] sm:$0xff] %v4212_v20 }
 0x300   : > { %1395 = vperm.xlu2 %3054, %v1390_v5  }
 0x303   : > { %v4216_v39 = vpop.permute.xlu2 %1143 }
 0x304   : > { %5199 = vst [vmem:[#allocation11_spill] sm:$0xff] %v4216_v39  ;;  %v1542_v36 = vmul.f32 %v4216_v39, %v4126_v59 }
 0x306   : > { %1841 = vperm.xlu0 %3056, %v1544_v2   ;;  %v4223_v29 = vpop.permute.xlu1 %1346  ;;  %1835 = vperm.xlu1 %3057, %v1542_v36   ;;  %v4232_v42 = vpop.permute.xlu0 %1381 }
 0x307   : > { %5200 = vst [vmem:[#allocation12_spill] sm:$0xff] %v4223_v29 }
 0x308   : > { %1416 = vperm.xlu2 %3054, %v1411_v40   ;;  %v1556_v40 = vmul.f32 %v4172_v35, %v4126_v59 }
 0x30b   : > { %v4225_v23 = vpop.permute.xlu2 %1164 }
 0x30c   : > { %5201 = vst [vmem:[#allocation13_spill] sm:$0xff] %v4225_v23  ;;  %v1545_v25 = vmul.f32 %v4225_v23, %v4126_v59 }
 0x30e   : > { %1850 = vperm.xlu0 %3056, %v1547_v50   ;;  %v4234_v37 = vpop.permute.xlu1 %1367  ;;  %1844 = vperm.xlu1 %3057, %v1545_v25   ;;  %v4245_v4 = vpop.permute.xlu0 %1402 }
 0x30f   : > { %5202 = vst [vmem:[#allocation14_spill] sm:$0xff] %v4234_v37 }
 0x310   : > { %1437 = vperm.xlu2 %3054, %v1432_v62   ;;  %v1528_v62 = vmul.f32 %v4078_v22, %v4126_v59 }
 0x313   : > { %v4236_v41 = vpop.permute.xlu2 %1185 }
 0x314   : > { %5203 = vst [vmem:[#allocation15_spill] sm:$0xff] %v4236_v41  ;;  %v1548_v30 = vmul.f32 %v4236_v41, %v4126_v59 }
 0x316   : > { %1859 = vperm.xlu0 %3056, %v1550_v8   ;;  %v4243_v18 = vpop.permute.xlu1 %1388  ;;  %1853 = vperm.xlu1 %3057, %v1548_v30   ;;  %v4258_v2 = vpop.permute.xlu0 %1423  ;;  %v1559_v30 = vmul.f32 %v4181_v31, %v4126_v59 }
 0x317   : > { %5204 = vst [vmem:[#allocation16_spill] sm:$0xff] %v4243_v18 }
 0x318   : > { %1458 = vperm.xlu2 %3054, %v1453_v7  }
 0x31b   : > { %v4247_v24 = vpop.permute.xlu2 %1206 }
 0x31c   : > { %5205 = vst [vmem:[#allocation17_spill] sm:$0xff] %v4247_v24  ;;  %v1551_v54 = vmul.f32 %v4247_v24, %v4126_v59 }
 0x31e   : > { %1868 = vperm.xlu0 %3056, %v1553_v13   ;;  %v4253_v5 = vpop.permute.xlu1 %1409  ;;  %1862 = vperm.xlu1 %3057, %v1551_v54   ;;  %v1531_v54 = vmul.f32 %v4108_v44, %v4126_v59 }
 0x31f   : > { %5206 = vst [vmem:[#allocation18_spill] sm:$0xff] %v4253_v5 }
 0x320   : > { %3058 = vset.pattern.permute.xlu2 %v3255_v6  ;;  %v4270_v6 = vpop.permute.xlu0 %1444 }
 0x321   : > { %1787 = vperm.xlu2 %3058, %v1526_v32  }
 0x323   : > { %v4260_v36 = vpop.permute.xlu2 %1227 }
 0x324   : > { %5207 = vst [vmem:[#allocation19_spill] sm:$0xff] %v4260_v36  ;;  %v1554_v50 = vmul.f32 %v4260_v36, %v4126_v59 }
 0x326   : > { %1877 = vperm.xlu0 %3056, %v1556_v40   ;;  %v4266_v25 = vpop.permute.xlu1 %1430  ;;  %1871 = vperm.xlu1 %3057, %v1554_v50   ;;  %v1562_v40 = vmul.f32 %v4190_v49, %v4126_v59 }
 0x327   : > { %5208 = vst [vmem:[#allocation20_spill] sm:$0xff] %v4266_v25 }
 0x329   : > { %1793 = vperm.xlu2 %3058, %v1528_v62   ;;  %v1782_v62 = vpop.permute.xlu0 %1781 }
 0x32a   : > { %v2164_v36 = vperm.slane %v1782_v62, %v3781_v16 }
 0x32b   : > { %v4272_v8 = vpop.permute.xlu2 %1248 }
 0x32c   : > { %5209 = vst [vmem:[#allocation21_spill] sm:$0xff] %v4272_v8  ;;  %v1557_v7 = vmul.f32 %v4272_v8, %v4126_v59 }
 0x32e   : > { %1886 = vperm.xlu0 %3056, %v1559_v30   ;;  %v4278_v13 = vpop.permute.xlu1 %1451  ;;  %1880 = vperm.xlu1 %3057, %v1557_v7   ;;  %v1534_v30 = vmul.f32 %v4110_v60, %v4126_v59 }
 0x32f   : > { %5210 = vst [vmem:[#allocation22_spill] sm:$0xff] %v4278_v13 }
 0x331   : > { %1802 = vperm.xlu2 %3058, %v1531_v54  }
 0x333   : > { %v4282_v32 = vpop.permute.xlu2 %1269 }
 0x334   : > { %5211 = vst [vmem:[#allocation23_spill] sm:$0xff] %v4282_v32  ;;  %v1560_v50 = vmul.f32 %v4282_v32, %v4126_v59  ;;  %v1565_v32 = vmul.f32 %v4201_v51, %v4126_v59 }
 0x336   : > { %1895 = vperm.xlu0 %3056, %v1562_v40   ;;  %1889 = vperm.xlu1 %3057, %v1560_v50   ;;  %v1537_v50 = vmul.f32 %v4194_v63, %v4126_v59 }
 0x337   : > { %v1785_v8 = vpop.permute.xlu1 %1784 }
 0x338   : > { %v2165_v7 = vperm.slane %v1785_v8, %v3781_v16 }
 0x339   : > { %1811 = vperm.xlu2 %3058, %v1534_v30   ;;  %v1540_v30 = vmul.f32 %v4115_v46, %v4126_v59 }
 0x33a   : > { %v4293_v54 = vsel %vm976_vm7, %v2165_v7, %v2164_v36  ;;  %v1568_v36 = vmul.f32 %v4212_v20, %v4126_v59  ;;  %v1571_v7 = vmul.f32 %v4223_v29, %v4126_v59 }
 0x33b   : > { %v4295_v24 = vpop.permute.xlu2 %1290 }
 0x33c   : > { %5212 = vst [vmem:[#allocation24_spill] sm:$0xff] %v4295_v24  ;;  %v1563_v40 = vmul.f32 %v4295_v24, %v4126_v59 }
 0x33e   : > { %1904 = vperm.xlu0 %3056, %v1565_v32   ;;  %1898 = vperm.xlu1 %3057, %v1563_v40  }
 0x341   : > { %1820 = vperm.xlu2 %3058, %v1537_v50   ;;  %v4317_v50 = vpop.permute.xlu0 %1796 }
 0x343   : > { %v4303_v62 = vpop.permute.xlu2 %1311 }
 0x344   : > { %5213 = vst [vmem:[#allocation25_spill] sm:$0xff] %v4303_v62  ;;  %v1566_v8 = vmul.f32 %v4303_v62, %v4126_v59  ;;  %v1543_v62 = vmul.f32 %v4122_v10, %v4126_v59 }
 0x346   : > { %1913 = vperm.xlu0 %3056, %v1568_v36   ;;  %1907 = vperm.xlu1 %3057, %v1566_v8   ;;  %v4321_v36 = vpop.permute.xlu1 %1790 }
 0x349   : > { %1829 = vperm.xlu2 %3058, %v1540_v30   ;;  %v1574_v30 = vmul.f32 %v4234_v37, %v4126_v59 }
 0x34b   : > { %v4311_v32 = vpop.permute.xlu2 %1332 }
 0x34c   : > { %5214 = vst [vmem:[#allocation26_spill] sm:$0xff] %v4311_v32  ;;  %v1569_v40 = vmul.f32 %v4311_v32, %v4126_v59  ;;  %v1546_v32 = vmul.f32 %v4133_v45, %v4126_v59 }
 0x34e   : > { %1922 = vperm.xlu0 %3056, %v1571_v7   ;;  %1916 = vperm.xlu1 %3057, %v1569_v40   ;;  %v1806_v7 = vpop.permute.xlu0 %1805 }
 0x34f   : > { %v2172_v23 = vperm.slane %v1806_v7, %v3781_v16 }
 0x351   : > { %1838 = vperm.xlu2 %3058, %v1543_v62   ;;  %v1577_v62 = vmul.f32 %v4243_v18, %v4126_v59  ;;  %v1580_v18 = vmul.f32 %v4253_v5, %v4126_v59  ;;  %v1583_v5 = vmul.f32 %v4266_v25, %v4126_v59 }
 0x353   : > { %v4323_v8 = vpop.permute.xlu2 %1353 }
 0x354   : > { %5215 = vst [vmem:[#allocation27_spill] sm:$0xff] %v4323_v8  ;;  %v1572_v24 = vmul.f32 %v4323_v8, %v4126_v59 }
 0x356   : > { %1931 = vperm.xlu0 %3056, %v1574_v30   ;;  %1925 = vperm.xlu1 %3057, %v1572_v24   ;;  %v1549_v30 = vmul.f32 %v4141_v33, %v4126_v59 }
 0x358   : > { %v4331_v41 = vpop.permute.xlu1 %1799 }
 0x359   : > { %1847 = vperm.xlu2 %3058, %v1546_v32  }
 0x35b   : > { %v4333_v40 = vpop.permute.xlu2 %1374 }
 0x35c   : > { %5216 = vst [vmem:[#allocation28_spill] sm:$0xff] %v4333_v40  ;;  %v1575_v37 = vmul.f32 %v4333_v40, %v4126_v59 }
 0x35e   : > { %1940 = vperm.xlu0 %3056, %v1577_v62   ;;  %1934 = vperm.xlu1 %3057, %v1575_v37   ;;  %v1552_v37 = vmul.f32 %v4151_v56, %v4126_v59 }
 0x360   : > { %v4341_v8 = vpop.permute.xlu0 %1814  ;;  %v1809_v24 = vpop.permute.xlu1 %1808 }
 0x361   : > { %1856 = vperm.xlu2 %3058, %v1549_v30   ;;  %v2173_v32 = vperm.slane %v1809_v24, %v3781_v16 }
 0x363   : > { %v4345_v29 = vpop.permute.xlu2 %1395  ;;  %v4350_v40 = vsel %vm976_vm7, %v2173_v32, %v2172_v23 }
 0x364   : > { %5217 = vst [vmem:[#allocation29_spill] sm:$0xff] %v4345_v29  ;;  %v1578_v62 = vmul.f32 %v4345_v29, %v4126_v59 }
 0x366   : > { %1949 = vperm.xlu0 %3056, %v1580_v18   ;;  %1943 = vperm.xlu1 %3057, %v1578_v62   ;;  %v1555_v18 = vmul.f32 %v4158_v9, %v4126_v59 }
 0x368   : > { %v4356_v30 = vpop.permute.xlu0 %1823  ;;  %v4358_v7 = vpop.permute.xlu1 %1817 }
 0x369   : > { %1865 = vperm.xlu2 %3058, %v1552_v37   ;;  %v1586_v37 = vmul.f32 %v4278_v13, %v4126_v59 }
 0x36b   : > { %v4360_v24 = vpop.permute.xlu2 %1416 }
 0x36c   : > { %5218 = vst [vmem:[#allocation30_spill] sm:$0xff] %v4360_v24  ;;  %v1581_v23 = vmul.f32 %v4360_v24, %v4126_v59 }
 0x36e   : > { %1958 = vperm.xlu0 %3056, %v1583_v5   ;;  %1952 = vperm.xlu1 %3057, %v1581_v23   ;;  %v1558_v5 = vmul.f32 %v4163_v21, %v4126_v59  ;;  %v4381_v23 = vmax.f32 %v4167_v0, 0.0 }
 0x370   : > { %v4368_v32 = vpop.permute.xlu0 %1832  ;;  %v4370_v62 = vpop.permute.xlu1 %1826  ;;  %v1589_v13 = vmul.f32 %v4058_v43, %v4381_v23  ;;  %v1590_v43 = vmul.f32 %v4069_v19, %v4381_v23 }
 0x371   : > { %1874 = vperm.xlu2 %3058, %v1555_v18  }
 0x373   : > { %v4372_v29 = vpop.permute.xlu2 %1437 }
 0x374   : > { %5219 = vst [vmem:[#allocation31_spill] sm:$0xff] %v4372_v29  ;;  %v1584_v25 = vmul.f32 %v4372_v29, %v4126_v59 }
 0x376   : > { %1967 = vperm.xlu0 %3056, %v1586_v37   ;;  %1961 = vperm.xlu1 %3057, %v1584_v25   ;;  %v1561_v25 = vmul.f32 %v4170_v15, %v4126_v59 }
 0x378   : > { %v4383_v24 = vpop.permute.xlu0 %1841  ;;  %v4385_v39 = vpop.permute.xlu1 %1835 }
 0x379   : > { %1883 = vperm.xlu2 %3058, %v1558_v5   ;;  %v1592_v5 = vmul.f32 %v4078_v22, %v4381_v23 }
 0x37b   : > { %v4387_v18 = vpop.permute.xlu2 %1458 }
 0x37c   : > { %5220 = vst [vmem:[#allocation32_spill] sm:$0xff] %v4387_v18  ;;  %v1587_v37 = vmul.f32 %v4387_v18, %v4126_v59  ;;  %v1564_v18 = vmul.f32 %v4179_v27, %v4126_v59 }
 0x37e   : > { %1976 = vperm.xlu0 %3056, %v1589_v13   ;;  %1970 = vperm.xlu1 %3057, %v1587_v37   ;;  %v2167_v13 = vperm.slane %v4321_v36, %v3781_v16 }
 0x380   : > { %v4395_v0 = vpop.permute.xlu0 %1850  ;;  %v4397_v29 = vpop.permute.xlu1 %1844 }
 0x381   : > { %1892 = vperm.xlu2 %3058, %v1561_v25  }
 0x383   : > { %v1788_v20 = vpop.permute.xlu2 %1787 }
 0x384   : > { %v2166_v12 = vperm.slane %v1788_v20, %v3781_v16  ;;  %v1595_v20 = vmul.f32 %v4108_v44, %v4381_v23 }
 0x386   : > { %v2293_v37 = vsel %vm978_vm8, %v2166_v12, %v4293_v54  ;;  %1985 = vperm.xlu0 %3056, %v1592_v5   ;;  %1979 = vperm.xlu1 %3057, %v1590_v43   ;;  %v1593_v12 = vmul.f32 %v4088_v52, %v4381_v23  ;;  %v2169_v54 = vperm.slane %v4317_v50, %v3781_v16 }
 0x387   : > { %v2294_v25 = vsel %vm980_vm9, %v2167_v13, %v2293_v37  ;;  %v2170_v5 = vperm.slane %v4331_v41, %v3781_v16  ;;  %v1567_v43 = vmul.f32 %v4192_v47, %v4126_v59  ;;  %v1598_v41 = vmul.f32 %v4110_v60, %v4381_v23 }
 0x388   : > { %v4411_v51 = vpop.permute.xlu0 %1859  ;;  %v4413_v22 = vpop.permute.xlu1 %1853  ;;  %v1601_v60 = vmul.f32 %v4194_v63, %v4381_v23 }
 0x389   : > { %1901 = vperm.xlu2 %3058, %v1564_v18  }
 0x38b   : > { %v1794_v19 = vpop.permute.xlu2 %1793 }
 0x38c   : > { %v2168_v36 = vperm.slane %v1794_v19, %v3781_v16  ;;  %v1596_v19 = vmul.f32 %v4093_v34, %v4381_v23  ;;  %v1599_v34 = vmul.f32 %v4183_v3, %v4381_v23 }
 0x38e   : > { %v2296_v18 = vsel %vm2295_vm11, %v2168_v36, %v2294_v25  ;;  %1994 = vperm.xlu0 %3056, %v1595_v20   ;;  %1988 = vperm.xlu1 %3057, %v1593_v12   ;;  %v1570_v36 = vmul.f32 %v4203_v53, %v4126_v59 }
 0x38f   : > { %v2298_v44 = vsel %vm2297_vm12, %v2169_v54, %v2296_v18 }
 0x390   : > { %v4428_v13 = vpop.permute.xlu0 %1868  ;;  %v2300_v52 = vsel %vm2299_vm13, %v2170_v5, %v2298_v44  ;;  %v4431_v37 = vpop.permute.xlu1 %1862  ;;  %v2176_v44 = vperm.slane %v4358_v7, %v3781_v16 }
 0x391   : > { %1910 = vperm.xlu2 %3058, %v1567_v43   ;;  %v2175_v43 = vperm.slane %v4341_v8, %v3781_v16 }
 0x393   : > { %v1803_v50 = vpop.permute.xlu2 %1802 }
 0x394   : > { %v2171_v25 = vperm.slane %v1803_v50, %v3781_v16  ;;  %v1573_v50 = vmul.f32 %v4214_v58, %v4126_v59 }
 0x396   : > { %2003 = vperm.xlu0 %3056, %v1598_v41   ;;  %v4439_v20 = vsel %vm2301_vm14, %v2171_v25, %v2300_v52  ;;  %1997 = vperm.xlu1 %3057, %v1596_v19  }
 0x398   : > { %v1878_v12 = vpop.permute.xlu0 %1877  ;;  %v4443_v54 = vpop.permute.xlu1 %1871 }
 0x399   : > { %1919 = vperm.xlu2 %3058, %v1570_v36   ;;  %v2196_v8 = vperm.slane %v1878_v12, %v3781_v16  ;;  %v2179_v12 = vperm.slane %v4370_v62, %v3781_v16  ;;  %v1607_v62 = vmul.f32 %v4122_v10, %v4381_v23 }
 0x39b   : > { %v1812_v5 = vpop.permute.xlu2 %1811 }
 0x39c   : > { %v2174_v18 = vperm.slane %v1812_v5, %v3781_v16 }
 0x39e   : > { %v2304_v52 = vsel %vm978_vm8, %v2174_v18, %v4350_v40  ;;  %2012 = vperm.xlu0 %3056, %v1601_v60   ;;  %2006 = vperm.xlu1 %3057, %v1599_v34   ;;  %v1604_v40 = vmul.f32 %v4115_v46, %v4381_v23  ;;  %v1602_v60 = vmul.f32 %v4124_v1, %v4381_v23 }
 0x39f   : > { %v2305_v63 = vsel %vm980_vm9, %v2175_v43, %v2304_v52  ;;  %v2178_v18 = vperm.slane %v4356_v30, %v3781_v16  ;;  %v1576_v46 = vmul.f32 %v4232_v42, %v4126_v59 }
 0x3a0   : > { %v4459_v41 = vpop.permute.xlu0 %1886  ;;  %v2306_v3 = vsel %vm2295_vm11, %v2176_v44, %v2305_v63  ;;  %v1881_v25 = vpop.permute.xlu1 %1880 }
 0x3a1   : > { %1928 = vperm.xlu2 %3058, %v1573_v50   ;;  %v2197_v7 = vperm.slane %v1881_v25, %v3781_v16  ;;  %v2181_v50 = vperm.slane %v4368_v32, %v3781_v16  ;;  %v2182_v25 = vperm.slane %v4385_v39, %v3781_v16 }
 0x3a3   : > { %v1821_v19 = vpop.permute.xlu2 %1820  ;;  %v4467_v36 = vsel %vm976_vm7, %v2197_v7, %v2196_v8  ;;  %v1579_v7 = vmul.f32 %v4245_v4, %v4126_v59 }
 0x3a4   : > { %v2177_v5 = vperm.slane %v1821_v19, %v3781_v16 }
 0x3a6   : > { %v2307_v34 = vsel %vm2297_vm12, %v2177_v5, %v2306_v3  ;;  %2021 = vperm.xlu0 %3056, %v1604_v40   ;;  %2015 = vperm.xlu1 %3057, %v1602_v60   ;;  %v1605_v3 = vmul.f32 %v4135_v14, %v4381_v23  ;;  %v1610_v14 = vmul.f32 %v4133_v45, %v4381_v23 }
 0x3a7   : > { %v2308_v43 = vsel %vm2299_vm13, %v2178_v18, %v2307_v34  ;;  %v1608_v5 = vmul.f32 %v4143_v11, %v4381_v23  ;;  %v2184_v60 = vperm.slane %v4383_v24, %v3781_v16  ;;  %v2185_v18 = vperm.slane %v4397_v29, %v3781_v16 }
 0x3a8   : > { %v4480_v44 = vpop.permute.xlu0 %1895  ;;  %v4483_v52 = vsel %vm2301_vm14, %v2179_v12, %v2308_v43  ;;  %v4485_v1 = vpop.permute.xlu1 %1889  ;;  %v1582_v34 = vmul.f32 %v4258_v2, %v4126_v59  ;;  %v1613_v29 = vmul.f32 %v4141_v33, %v4381_v23 }
 0x3a9   : > { %1937 = vperm.xlu2 %3058, %v1576_v46  }
 0x3ab   : > { %v1830_v30 = vpop.permute.xlu2 %1829 }
 0x3ac   : > { %v2180_v63 = vperm.slane %v1830_v30, %v3781_v16 }
 0x3ae   : > { %v2310_v8 = vsel %vm976_vm7, %v2181_v50, %v2180_v63  ;;  %2030 = vperm.xlu0 %3056, %v1607_v62   ;;  %2024 = vperm.xlu1 %3057, %v1605_v3   ;;  %v1611_v62 = vmul.f32 %v4153_v48, %v4381_v23  ;;  %v2187_v50 = vperm.slane %v4395_v0, %v3781_v16 }
 0x3af   : > { %v2311_v10 = vsel %vm978_vm8, %v2182_v25, %v2310_v8  ;;  %v1585_v3 = vmul.f32 %v4270_v6, %v4126_v59  ;;  %v1616_v48 = vmul.f32 %v4151_v56, %v4381_v23  ;;  %v2188_v0 = vperm.slane %v4413_v22, %v3781_v16 }
 0x3b0   : > { %v4500_v19 = vpop.permute.xlu0 %1904  ;;  %v4502_v32 = vpop.permute.xlu1 %1898  ;;  %v1614_v59 = vmul.f32 %v4160_v57, %v4381_v23  ;;  %v1588_v56 = vmul.f32 %v4031_v61, %v4381_v23  ;;  %v2193_v61 = vperm.slane %v4428_v13, %v3781_v16 }
 0x3b1   : > { %1946 = vperm.xlu2 %3058, %v1579_v7  }
 0x3b3   : > { %v1839_v40 = vpop.permute.xlu2 %1838 }
 0x3b4   : > { %v2183_v39 = vperm.slane %v1839_v40, %v3781_v16  ;;  %v2190_v40 = vperm.slane %v4411_v51, %v3781_v16 }
 0x3b6   : > { %v2312_v12 = vsel %vm980_vm9, %v2183_v39, %v2311_v10  ;;  %2039 = vperm.xlu0 %3056, %v1610_v14   ;;  %2033 = vperm.xlu1 %3057, %v1608_v5   ;;  %v2191_v14 = vperm.slane %v4431_v37, %v3781_v16  ;;  %v1619_v37 = vmul.f32 %v4158_v9, %v4381_v23 }
 0x3b7   : > { %v2313_v46 = vsel %vm2295_vm11, %v2184_v60, %v2312_v12  ;;  %v1617_v12 = vmul.f32 %v4165_v55, %v4381_v23 }
 0x3b8   : > { %v4517_v45 = vpop.permute.xlu0 %1913  ;;  %v2314_v43 = vsel %vm2297_vm12, %v2185_v18, %v2313_v46  ;;  %v4520_v11 = vpop.permute.xlu1 %1907 }
 0x3b9   : > { %1955 = vperm.xlu2 %3058, %v1582_v34   ;;  %v2194_v34 = vperm.slane %v4443_v54, %v3781_v16  ;;  %v1622_v54 = vmul.f32 %v4163_v21, %v4381_v23  ;;  %v1625_v21 = vmul.f32 %v4170_v15, %v4381_v23 }
 0x3bb   : > { %v1848_v24 = vpop.permute.xlu2 %1847 }
 0x3bc   : > { %v2186_v30 = vperm.slane %v1848_v24, %v3781_v16 }
 0x3be   : > { %2048 = vperm.xlu0 %3056, %v1613_v29   ;;  %v2315_v63 = vsel %vm2299_vm13, %v2186_v30, %v2314_v43  ;;  %2042 = vperm.xlu1 %3057, %v1611_v62   ;;  %v1591_v43 = vmul.f32 %v4073_v38, %v4381_v23  ;;  %v1620_v62 = vmul.f32 %v4172_v35, %v4381_v23 }
 0x3bf   : > { %v4533_v25 = vsel %vm2301_vm14, %v2187_v50, %v2315_v63  ;;  %v1594_v50 = vmul.f32 %v4174_v28, %v4381_v23  ;;  %v1623_v35 = vmul.f32 %v4181_v31, %v4381_v23  ;;  %v2200_v28 = vperm.slane %v4485_v1, %v3781_v16 }
 0x3c0   : > { %v4535_v8 = vpop.permute.xlu0 %1922  ;;  %v4537_v33 = vpop.permute.xlu1 %1916 }
 0x3c1   : > { %1964 = vperm.xlu2 %3058, %v1585_v3  }
 0x3c3   : > { %v1857_v7 = vpop.permute.xlu2 %1856 }
 0x3c4   : > { %v2189_v10 = vperm.slane %v1857_v7, %v3781_v16 }
 0x3c6   : > { %v2317_v39 = vsel %vm976_vm7, %v2189_v10, %v2188_v0  ;;  %2057 = vperm.xlu0 %3056, %v1616_v48   ;;  %2051 = vperm.xlu1 %3057, %v1614_v59   ;;  %v2199_v0 = vperm.slane %v4459_v41, %v3781_v16  ;;  %v1597_v59 = vmul.f32 %v4098_v26, %v4381_v23 }
 0x3c7   : > { %v2318_v5 = vsel %vm978_vm8, %v2190_v40, %v2317_v39 }
 0x3c8   : > { %v4554_v22 = vpop.permute.xlu0 %1931  ;;  %v2319_v60 = vsel %vm980_vm9, %v2191_v14, %v2318_v5  ;;  %v4557_v57 = vpop.permute.xlu1 %1925  ;;  %v1626_v5 = vmul.f32 %v4190_v49, %v4381_v23 }
 0x3c9   : > { %1973 = vperm.xlu2 %3058, %v1588_v56  }
 0x3cb   : > { %v1866_v51 = vpop.permute.xlu2 %1865 }
 0x3cc   : > { %v2192_v18 = vperm.slane %v1866_v51, %v3781_v16  ;;  %v2203_v51 = vperm.slane %v4502_v32, %v3781_v16  ;;  %v1631_v32 = vmul.f32 %v4192_v47, %v4381_v23 }
 0x3ce   : > { %v2320_v46 = vsel %vm2295_vm11, %v2192_v18, %v2319_v60  ;;  %2066 = vperm.xlu0 %3056, %v1619_v37   ;;  %2060 = vperm.xlu1 %3057, %v1617_v12   ;;  %v2202_v60 = vperm.slane %v4480_v44, %v3781_v16 }
 0x3cf   : > { %v2321_v9 = vsel %vm2297_vm12, %v2193_v61, %v2320_v46  ;;  %v5221_v46 = vld [vmem:[#allocation8_spill] sm:$0xff] }
 0x3d0   : > { %v4572_v24 = vpop.permute.xlu0 %1940  ;;  %v2322_v29 = vsel %vm2299_vm13, %v2194_v34, %v2321_v9  ;;  %v4575_v55 = vpop.permute.xlu1 %1934  ;;  %v2205_v34 = vperm.slane %v4500_v19, %v3781_v16  ;;  %v2206_v9 = vperm.slane %v4520_v11, %v3781_v16 }
 0x3d1   : > { %1982 = vperm.xlu2 %3058, %v1591_v43   ;;  %v1629_v43 = vmul.f32 %v5221_v46, %v4381_v23  ;;  %v5228_v46 = vld [vmem:[#allocation15_spill] sm:$0xff] }
 0x3d3   : > { %v1875_v13 = vpop.permute.xlu2 %1874 }
 0x3d4   : > { %v2195_v30 = vperm.slane %v1875_v13, %v3781_v16  ;;  %v5222_v13 = vld [vmem:[#allocation9_spill] sm:$0xff] }
 0x3d6   : > { %2075 = vperm.xlu0 %3056, %v1622_v54   ;;  %v4583_v38 = vsel %vm2301_vm14, %v2195_v30, %v2322_v29  ;;  %2069 = vperm.xlu1 %3057, %v1620_v62   ;;  %v1603_v54 = vmul.f32 %v5222_v13, %v4381_v23  ;;  %v5229_v13 = vld [vmem:[#allocation30_spill] sm:$0xff] }
 0x3d8   : > { %v1950_v63 = vpop.permute.xlu0 %1949  ;;  %v4587_v3 = vpop.permute.xlu1 %1943 }
 0x3d9   : > { %1991 = vperm.xlu2 %3058, %v1594_v50   ;;  %v2220_v41 = vperm.slane %v1950_v63, %v3781_v16  ;;  %v1634_v50 = vmul.f32 %v4203_v53, %v4381_v23  ;;  %v5223_v63 = vld [vmem:[#allocation10_spill] sm:$0xff] }
 0x3db   : > { %v1884_v7 = vpop.permute.xlu2 %1883 }
 0x3dc   : > { %v2198_v48 = vperm.slane %v1884_v7, %v3781_v16  ;;  %v1632_v7 = vmul.f32 %v5223_v63, %v4381_v23 }
 0x3de   : > { %v2325_v10 = vsel %vm978_vm8, %v2198_v48, %v4467_v36  ;;  %2084 = vperm.xlu0 %3056, %v1625_v21   ;;  %2078 = vperm.xlu1 %3057, %v1623_v35   ;;  %v1628_v36 = vmul.f32 %v4179_v27, %v4381_v23  ;;  %v1600_v27 = vmul.f32 %v4117_v17, %v4381_v23 }
 0x3df   : > { %v2326_v15 = vsel %vm980_vm9, %v2199_v0, %v2325_v10  ;;  %v2208_v21 = vperm.slane %v4517_v45, %v3781_v16  ;;  %v2209_v48 = vperm.slane %v4537_v33, %v3781_v16  ;;  %v5224_v0 = vld [vmem:[#allocation11_spill] sm:$0xff]  ;;  %v1637_v33 = vmul.f32 %v4214_v58, %v4381_v23 }
 0x3e0   : > { %v4603_v40 = vpop.permute.xlu0 %1958  ;;  %v2327_v31 = vsel %vm2295_vm11, %v2200_v28, %v2326_v15  ;;  %v1953_v14 = vpop.permute.xlu1 %1952  ;;  %v1606_v28 = vmul.f32 %v5224_v0, %v4381_v23 }
 0x3e1   : > { %2000 = vperm.xlu2 %3058, %v1597_v59   ;;  %v2221_v1 = vperm.slane %v1953_v14, %v3781_v16  ;;  %v5225_v14 = vld [vmem:[#allocation12_spill] sm:$0xff] }
 0x3e3   : > { %v1893_v39 = vpop.permute.xlu2 %1892  ;;  %v4611_v56 = vsel %vm976_vm7, %v2221_v1, %v2220_v41  ;;  %v1635_v41 = vmul.f32 %v5225_v14, %v4381_v23  ;;  %v2211_v1 = vperm.slane %v4535_v8, %v3781_v16  ;;  %v2212_v8 = vperm.slane %v4557_v57, %v3781_v16 }
 0x3e4   : > { %v2201_v26 = vperm.slane %v1893_v39, %v3781_v16 }
 0x3e6   : > { %v2328_v37 = vsel %vm2297_vm12, %v2201_v26, %v2327_v31  ;;  %2093 = vperm.xlu0 %3056, %v1628_v36   ;;  %2087 = vperm.xlu1 %3057, %v1626_v5   ;;  %v5226_v36 = vld [vmem:[#allocation13_spill] sm:$0xff] }
 0x3e7   : > { %v2329_v18 = vsel %vm2299_vm13, %v2202_v60, %v2328_v37  ;;  %v1609_v26 = vmul.f32 %v5226_v36, %v4381_v23  ;;  %v1640_v37 = vmul.f32 %v4232_v42, %v4381_v23  ;;  %v1612_v42 = vmul.f32 %v5228_v46, %v4381_v23 }
 0x3e8   : > { %v4624_v12 = vpop.permute.xlu0 %1967  ;;  %v4627_v61 = vsel %vm2301_vm14, %v2203_v51, %v2329_v18  ;;  %v4629_v49 = vpop.permute.xlu1 %1961  ;;  %v5227_v18 = vld [vmem:[#allocation14_spill] sm:$0xff] }
 0x3e9   : > { %2009 = vperm.xlu2 %3058, %v1600_v27  }
 0x3eb   : > { %v1902_v44 = vpop.permute.xlu2 %1901 }
 0x3ec   : > { %v2204_v17 = vperm.slane %v1902_v44, %v3781_v16  ;;  %v1638_v44 = vmul.f32 %v5227_v18, %v4381_v23  ;;  %v5235_v18 = vld [vmem:[#allocation21_spill] sm:$0xff] }
 0x3ee   : > { %v2331_v29 = vsel %vm976_vm7, %v2205_v34, %v2204_v17  ;;  %2102 = vperm.xlu0 %3056, %v1631_v32   ;;  %2096 = vperm.xlu1 %3057, %v1629_v43   ;;  %v2214_v32 = vperm.slane %v4554_v22, %v3781_v16  ;;  %v2215_v34 = vperm.slane %v4575_v55, %v3781_v16 }
 0x3ef   : > { %v2332_v47 = vsel %vm978_vm8, %v2206_v9, %v2331_v29  ;;  %v1645_v55 = vmul.f32 %v5229_v13, %v4381_v23  ;;  %v5236_v13 = vld [vmem:[#allocation23_spill] sm:$0xff] }
 0x3f0   : > { %v4644_v30 = vpop.permute.xlu0 %1976  ;;  %v4646_v19 = vpop.permute.xlu1 %1970 }
 0x3f1   : > { %2018 = vperm.xlu2 %3058, %v1603_v54  }
 0x3f3   : > { %v1911_v62 = vpop.permute.xlu2 %1910 }
 0x3f4   : > { %v2207_v11 = vperm.slane %v1911_v62, %v3781_v16 }
 0x3f6   : > { %v2333_v35 = vsel %vm980_vm9, %v2207_v11, %v2332_v47  ;;  %2111 = vperm.xlu0 %3056, %v1634_v50   ;;  %2105 = vperm.xlu1 %3057, %v1632_v7   ;;  %v5230_v47 = vld [vmem:[#allocation16_spill] sm:$0xff]  ;;  %v2217_v50 = vperm.slane %v4572_v24, %v3781_v16  ;;  %v2218_v11 = vperm.slane %v4587_v3, %v3781_v16  ;;  %v5231_v7 = vld [vmem:[#allocation17_spill] sm:$0xff] }
 0x3f7   : > { %v2334_v10 = vsel %vm2295_vm11, %v2208_v21, %v2333_v35  ;;  %v1641_v62 = vmul.f32 %v5230_v47, %v4381_v23  ;;  %v1615_v21 = vmul.f32 %v5231_v7, %v4381_v23  ;;  %v5238_v7 = vld [vmem:[#allocation25_spill] sm:$0xff] }
 0x3f8   : > { %v4661_v53 = vpop.permute.xlu0 %1985  ;;  %v2335_v59 = vsel %vm2297_vm12, %v2209_v48, %v2334_v10  ;;  %v4664_v15 = vpop.permute.xlu1 %1979  ;;  %v5232_v10 = vld [vmem:[#allocation31_spill] sm:$0xff] }
 0x3f9   : > { %2027 = vperm.xlu2 %3058, %v1606_v28   ;;  %v1648_v3 = vmul.f32 %v5232_v10, %v4381_v23  ;;  %v5239_v10 = vld [vmem:[#allocation26_spill] sm:$0xff] }
 0x3fb   : > { %v1920_v45 = vpop.permute.xlu2 %1919 }
 0x3fc   : > { %v2210_v31 = vperm.slane %v1920_v45, %v3781_v16  ;;  %v1646_v45 = vmul.f32 %v4258_v2, %v4381_v23  ;;  %v1649_v2 = vmul.f32 %v4270_v6, %v4381_v23 }
 0x3fe   : > { %2120 = vperm.xlu0 %3056, %v1637_v33   ;;  %v2336_v39 = vsel %vm2299_vm13, %v2210_v31, %v2335_v59  ;;  %2114 = vperm.xlu1 %3057, %v1635_v41   ;;  %v5233_v31 = vld [vmem:[#allocation19_spill] sm:$0xff] }
 0x3ff   : > { %v4677_v5 = vsel %vm2301_vm14, %v2211_v1, %v2336_v39  ;;  %v1618_v14 = vmul.f32 %v5233_v31, %v4381_v23  ;;  %v5234_v39 = vld [vmem:[#allocation22_spill] sm:$0xff] }
 0x400   : > { %v4679_v60 = vpop.permute.xlu0 %1994  ;;  %v4681_v58 = vpop.permute.xlu1 %1988  ;;  %v1650_v36 = vmul.f32 %v5234_v39, %v4381_v23  ;;  %v2425_v39 = vsel %vm2424_vm15, %v4439_v20, 0.0 }
 0x401   : > { %2036 = vperm.xlu2 %3058, %v1609_v26  }
 0x403   : > { %v1929_v51 = vpop.permute.xlu2 %1928 }
 0x404   : > { %v2213_v27 = vperm.slane %v1929_v51, %v3781_v16  ;;  %v2223_v51 = vperm.slane %v4603_v40, %v3781_v16 }
 0x406   : > { %v2338_v17 = vsel %vm976_vm7, %v2213_v27, %v2212_v8  ;;  %2129 = vperm.xlu0 %3056, %v1640_v37   ;;  %2123 = vperm.xlu1 %3057, %v1638_v44   ;;  %v2224_v8 = vperm.slane %v4629_v49, %v3781_v16  ;;  %v1621_v44 = vmul.f32 %v5235_v18, %v4381_v23 }
 0x407   : > { %v2339_v43 = vsel %vm978_vm8, %v2214_v32, %v2338_v17 }
 0x408   : > { %v2340_v57 = vsel %vm980_vm9, %v2215_v34, %v2339_v43  ;;  %v4699_v9 = vpop.permute.xlu1 %1997  ;;  %v4701_v29 = vpop.permute.xlu0 %2003  ;;  %v2226_v43 = vperm.slane %v4624_v12, %v3781_v16  ;;  %v5237_v12 = vld [vmem:[#allocation24_spill] sm:$0xff] }
 0x409   : > { %2045 = vperm.xlu2 %3058, %v1612_v42   ;;  %v1643_v42 = vmul.f32 %v4245_v4, %v4381_v23 }
 0x40b   : > { %v1938_v22 = vpop.permute.xlu2 %1937 }
 0x40c   : > { %v2216_v54 = vperm.slane %v1938_v22, %v3781_v16 }
 0x40e   : > { %v2341_v63 = vsel %vm2295_vm11, %v2216_v54, %v2340_v57  ;;  %2144 = vperm.xlu0 %3056, %v1645_v55   ;;  %2132 = vperm.xlu1 %3057, %v1641_v62   ;;  %v2227_v57 = vperm.slane %v4646_v19, %v3781_v16  ;;  %v1624_v55 = vmul.f32 %v5236_v13, %v4381_v23 }
 0x40f   : > { %v2342_v48 = vsel %vm2297_vm12, %v2217_v50, %v2341_v63  ;;  %v1627_v50 = vmul.f32 %v5237_v12, %v4381_v23 }
 0x410   : > { %v2343_v35 = vsel %vm2299_vm13, %v2218_v11, %v2342_v48  ;;  %v4717_v0 = vpop.permute.xlu1 %2006  ;;  %v4719_v28 = vpop.permute.xlu0 %2012 }
 0x411   : > { %2054 = vperm.xlu2 %3058, %v1615_v21   ;;  %v1630_v21 = vmul.f32 %v5238_v7, %v4381_v23 }
 0x413   : > { %v1947_v24 = vpop.permute.xlu2 %1946 }
 0x414   : > { %v2219_v59 = vperm.slane %v1947_v24, %v3781_v16 }
 0x416   : > { %2153 = vperm.xlu0 %3056, %v1648_v3   ;;  %v4727_v33 = vsel %vm2301_vm14, %v2219_v59, %v2343_v35  ;;  %2147 = vperm.xlu1 %3057, %v1646_v45   ;;  %v1633_v3 = vmul.f32 %v5239_v10, %v4381_v23 }
 0x418   : > { %v4731_v41 = vpop.permute.xlu1 %2015  ;;  %v2022_v37 = vpop.permute.xlu0 %2021 }
 0x419   : > { %2063 = vperm.xlu2 %3058, %v1618_v14   ;;  %v2244_v40 = vperm.slane %v2022_v37, %v3781_v16  ;;  %v5240_v14 = vld [vmem:[#allocation27_spill] sm:$0xff]  ;;  %v2229_v37 = vperm.slane %v4644_v30, %v3781_v16  ;;  %v2230_v30 = vperm.slane %v4664_v15, %v3781_v16  ;;  %v2232_v15 = vperm.slane %v4661_v53, %v3781_v16 }
 0x41a   : > { %v2443_v53 = vsel %vm2424_vm15, %v4727_v33, 0.0 }
 0x41b   : > { %v1956_v1 = vpop.permute.xlu2 %1955 }
 0x41c   : > { %v2222_v26 = vperm.slane %v1956_v1, %v3781_v16  ;;  %v1636_v1 = vmul.f32 %v5240_v14, %v4381_v23 }
 0x41e   : > { %v2346_v27 = vsel %vm978_vm8, %v2222_v26, %v4611_v56  ;;  %2159 = vperm.xlu0 %3056, %v1650_v36   ;;  %2156 = vperm.xlu1 %3057, %v1649_v2  }
 0x41f   : > { %v2347_v32 = vsel %vm980_vm9, %v2223_v51, %v2346_v27  ;;  %v2236_v51 = vperm.slane %v4699_v9, %v3781_v16  ;;  %v2434_v9 = vsel %vm2424_vm15, %v4583_v38, 0.0 }
 0x420   : > { %v2348_v34 = vsel %vm2295_vm11, %v2224_v8, %v2347_v32  ;;  %v2025_v6 = vpop.permute.xlu1 %2024  ;;  %v4763_v54 = vpop.permute.xlu0 %2030  ;;  %v5241_v8 = vld [vmem:[#allocation28_spill] sm:$0xff] }
 0x421   : > { %2072 = vperm.xlu2 %3058, %v1621_v44   ;;  %v2245_v17 = vperm.slane %v2025_v6, %v3781_v16  ;;  %v1639_v27 = vmul.f32 %v5241_v8, %v4381_v23  ;;  %v2238_v44 = vperm.slane %v4701_v29, %v3781_v16 }
 0x423   : > { %v1965_v46 = vpop.permute.xlu2 %1964  ;;  %v4751_v49 = vsel %vm976_vm7, %v2245_v17, %v2244_v40  ;;  %v2428_v40 = vsel %vm2424_vm15, %v4483_v52, 0.0 }
 0x424   : > { %v2225_v56 = vperm.slane %v1965_v46, %v3781_v16  ;;  %v2239_v46 = vperm.slane %v4717_v0, %v3781_v16  ;;  %v5242_v0 = vld [vmem:[#allocation18_spill] sm:$0xff] }
 0x426   : > { %v2349_v22 = vsel %vm2297_vm12, %v2225_v56, %v2348_v34  ;;  %2138 = vperm.xlu1 %3057, %v1643_v42  }
 0x427   : > { %v2350_v47 = vsel %vm2299_vm13, %v2226_v43, %v2349_v22 }
 0x428   : > { %v4767_v62 = vsel %vm2301_vm14, %v2227_v57, %v2350_v47  ;;  %v4771_v11 = vpop.permute.xlu1 %2033  ;;  %v4773_v19 = vpop.permute.xlu0 %2039  ;;  %v2241_v57 = vperm.slane %v4719_v28, %v3781_v16  ;;  %v2233_v47 = vperm.slane %v4681_v58, %v3781_v16  ;;  %v2440_v28 = vsel %vm2424_vm15, %v4677_v5, 0.0 }
 0x429   : > { %2081 = vperm.xlu2 %3058, %v1624_v55   ;;  %v1644_v55 = vmul.f32 %v5242_v0, %v4381_v23  ;;  %v2248_v14 = vperm.slane %v4771_v11, %v3781_v16 }
 0x42b   : > { %v1974_v4 = vpop.permute.xlu2 %1973 }
 0x42c   : > { %v2228_v26 = vperm.slane %v1974_v4, %v3781_v16 }
 0x42e   : > { %v2352_v32 = vsel %vm976_vm7, %v2229_v37, %v2228_v26 }
 0x42f   : > { %v2353_v56 = vsel %vm978_vm8, %v2230_v30, %v2352_v32 }
 0x430   : > { %v4777_v48 = vpop.permute.xlu1 %2042  ;;  %v4779_v35 = vpop.permute.xlu0 %2048 }
 0x431   : > { %2090 = vperm.xlu2 %3058, %v1627_v50  }
 0x433   : > { %v1983_v63 = vpop.permute.xlu2 %1982 }
 0x434   : > { %v2231_v34 = vperm.slane %v1983_v63, %v3781_v16  ;;  %v2242_v63 = vperm.slane %v4731_v41, %v3781_v16  ;;  %v2247_v41 = vperm.slane %v4763_v54, %v3781_v16 }
 0x436   : > { %v2354_v38 = vsel %vm980_vm9, %v2231_v34, %v2353_v56 }
 0x437   : > { %v2355_v22 = vsel %vm2295_vm11, %v2232_v15, %v2354_v38 }
 0x438   : > { %v4783_v45 = vpop.permute.xlu1 %2051  ;;  %v4785_v31 = vpop.permute.xlu0 %2057  ;;  %v2356_v58 = vsel %vm2297_vm12, %v2233_v47, %v2355_v22 }
 0x439   : > { %2099 = vperm.xlu2 %3058, %v1630_v21   ;;  %v2235_v21 = vperm.slane %v4679_v60, %v3781_v16  ;;  %v5243_v60 = vld [vmem:[#allocation20_spill] sm:$0xff]  ;;  %v2256_v22 = vperm.slane %v4785_v31, %v3781_v16 }
 0x43b   : > { %v1992_v24 = vpop.permute.xlu2 %1991 }
 0x43c   : > { %v2234_v13 = vperm.slane %v1992_v24, %v3781_v16 }
 0x43e   : > { %v2357_v33 = vsel %vm2299_vm13, %v2234_v13, %v2356_v58 }
 0x440   : > { %v4799_v18 = vpop.permute.xlu1 %2060  ;;  %v4806_v6 = vpop.permute.xlu0 %2066 }
 0x441   : > { %2108 = vperm.xlu2 %3058, %v1633_v3   ;;  %v2257_v13 = vperm.slane %v4799_v18, %v3781_v16 }
 0x443   : > { %v2001_v59 = vpop.permute.xlu2 %2000 }
 0x444   : > { %v2237_v36 = vperm.slane %v2001_v59, %v3781_v16  ;;  %v2358_v59 = vsel %vm2301_vm14, %v2235_v21, %v2357_v33 }
 0x446   : > { %v2359_v20 = vsel %vm976_vm7, %v2237_v36, %v2236_v51 }
 0x447   : > { %v2360_v17 = vsel %vm978_vm8, %v2238_v44, %v2359_v20  ;;  %v5244_v44 = vld [vmem:[#allocation29_spill] sm:$0xff] }
 0x448   : > { %2426 = vadd.xlane.f32.xlu0 %v2425_v39  ;;  %v2361_v52 = vsel %vm980_vm9, %v2239_v46, %v2360_v17  ;;  %v4834_v4 = vpop.permute.xlu1 %2069  ;;  %v4842_v7 = vpop.permute.xlu0 %2075  ;;  %v1647_v39 = vmul.f32 %v5243_v60, %v4381_v23  ;;  %v1642_v32 = vmul.f32 %v5244_v44, %v4381_v23  ;;  %v2253_v46 = vperm.slane %v4779_v35, %v3781_v16 }
 0x449   : > { %2117 = vperm.xlu2 %3058, %v1636_v1   ;;  %v2260_v58 = vperm.slane %v4834_v4, %v3781_v16 }
 0x44b   : > { %v2010_v2 = vpop.permute.xlu2 %2009 }
 0x44c   : > { %v2240_v29 = vperm.slane %v2010_v2, %v3781_v16  ;;  %v2449_v2 = vsel %vm2424_vm15, %v2358_v59, 0.0 }
 0x44e   : > { %v2362_v43 = vsel %vm2295_vm11, %v2240_v29, %v2361_v52 }
 0x44f   : > { %v2363_v50 = vsel %vm2297_vm12, %v2241_v57, %v2362_v43 }
 0x450   : > { %2435 = vadd.xlane.f32.xlu0 %v2434_v9  ;;  %2429 = vadd.xlane.f32.xlu1 %v2428_v40  ;;  %v2364_v5 = vsel %vm2299_vm13, %v2242_v63, %v2363_v50  ;;  %v2079_v51 = vpop.permute.xlu1 %2078  ;;  %v2085_v37 = vpop.permute.xlu0 %2084 }
 0x451   : > { %2126 = vperm.xlu2 %3058, %v1639_v27   ;;  %v2251_v27 = vperm.slane %v4777_v48, %v3781_v16  ;;  %v2265_v4 = vperm.slane %v2085_v37, %v3781_v16  ;;  %v2431_v37 = vsel %vm2424_vm15, %v4533_v25, 0.0 }
 0x453   : > { %v2019_v42 = vpop.permute.xlu2 %2018 }
 0x454   : > { %v2243_v12 = vperm.slane %v2019_v42, %v3781_v16  ;;  %v2254_v42 = vperm.slane %v4783_v45, %v3781_v16  ;;  %v2259_v45 = vperm.slane %v4806_v6, %v3781_v16  ;;  %v2262_v6 = vperm.slane %v4842_v7, %v3781_v16 }
 0x456   : > { %v2365_v3 = vsel %vm2301_vm14, %v2243_v12, %v2364_v5 }
 0x457   : > { %v2452_v26 = vsel %vm2424_vm15, %v2365_v3, 0.0  ;;  %v2263_v3 = vperm.slane %v2079_v51, %v3781_v16 }
 0x458   : > { %2444 = vadd.xlane.f32.xlu0 %v2443_v53  ;;  %2441 = vadd.xlane.f32.xlu1 %v2440_v28  ;;  %v2088_v40 = vpop.permute.xlu1 %2087  ;;  %v4876_v17 = vpop.permute.xlu0 %2093 }
 0x459   : > { %2141 = vperm.xlu2 %3058, %v1644_v55   ;;  %v2266_v60 = vperm.slane %v2088_v40, %v3781_v16 }
 0x45b   : > { %v2028_v24 = vpop.permute.xlu2 %2027 }
 0x45c   : > { %v2246_v10 = vperm.slane %v2028_v24, %v3781_v16 }
 0x45e   : > { %v2367_v1 = vsel %vm978_vm8, %v2246_v10, %v4751_v49  ;;  %v2250_v49 = vperm.slane %v4773_v19, %v3781_v16  ;;  %v5245_v19 = vld [vmem:[#allocation32_spill] sm:$0xff] }
 0x45f   : > { %v2368_v36 = vsel %vm980_vm9, %v2247_v41, %v2367_v1  ;;  %v1651_v29 = vmul.f32 %v5245_v19, %v4381_v23 }
 0x460   : > { %2453 = vadd.xlane.f32.xlu0 %v2452_v26  ;;  %v2369_v54 = vsel %vm2295_vm11, %v2248_v14, %v2368_v36  ;;  %2450 = vadd.xlane.f32.xlu1 %v2449_v2  ;;  %v2097_v52 = vpop.permute.xlu1 %2096  ;;  %v2103_v57 = vpop.permute.xlu0 %2102 }
 0x461   : > { %2150 = vperm.xlu2 %3058, %v1647_v39   ;;  %v2269_v44 = vperm.slane %v2097_v52, %v3781_v16 }
 0x463   : > { %v2037_v11 = vpop.permute.xlu2 %2036 }
 0x464   : > { %v2249_v8 = vperm.slane %v2037_v11, %v3781_v16 }
 0x466   : > { %v2370_v20 = vsel %vm2297_vm12, %v2249_v8, %v2369_v54 }
 0x467   : > { %v2371_v34 = vsel %vm2299_vm13, %v2250_v49, %v2370_v20 }
 0x468   : > { %v4874_v9 = vsel %vm2301_vm14, %v2251_v27, %v2371_v34  ;;  %v2106_v28 = vpop.permute.xlu1 %2105  ;;  %v2112_v50 = vpop.permute.xlu0 %2111  ;;  %v2437_v27 = vsel %vm2424_vm15, %v4627_v61, 0.0  ;;  %v2268_v34 = vperm.slane %v4876_v17, %v3781_v16  ;;  %v2446_v61 = vsel %vm2424_vm15, %v4767_v62, 0.0 }
 0x469   : > { %2135 = vperm.xlu2 %3058, %v1642_v32   ;;  %v2272_v17 = vperm.slane %v2106_v28, %v3781_v16  ;;  %v2455_v52 = vsel %vm2424_vm15, %v4874_v9, 0.0 }
 0x46b   : > { %v2046_v30 = vpop.permute.xlu2 %2045 }
 0x46c   : > { %v2252_v48 = vperm.slane %v2046_v30, %v3781_v16  ;;  %v2387_v30 = vsel %vm976_vm7, %v2269_v44, %v2268_v34 }
 0x46e   : > { %v2373_v56 = vsel %vm976_vm7, %v2253_v46, %v2252_v48 }
 0x46f   : > { %v2374_v43 = vsel %vm978_vm8, %v2254_v42, %v2373_v56 }
 0x470   : > { %v2115_v21 = vpop.permute.xlu1 %2114  ;;  %v2121_v24 = vpop.permute.xlu0 %2120 }
 0x471   : > { %2162 = vperm.xlu2 %3058, %v1651_v29   ;;  %v2271_v29 = vperm.slane %v2103_v57, %v3781_v16 }
 0x473   : > { %v2055_v38 = vpop.permute.xlu2 %2054 }
 0x474   : > { %v2255_v15 = vperm.slane %v2055_v38, %v3781_v16 }
 0x476   : > { %v2375_v23 = vsel %vm980_vm9, %v2255_v15, %v2374_v43  ;;  %v2274_v15 = vperm.slane %v2112_v50, %v3781_v16 }
 0x477   : > { %v2376_v35 = vsel %vm2295_vm11, %v2256_v22, %v2375_v23  ;;  %v2275_v22 = vperm.slane %v2115_v21, %v3781_v16 }
 0x478   : > { %v2377_v47 = vsel %vm2297_vm12, %v2257_v13, %v2376_v35  ;;  %v2124_v39 = vpop.permute.xlu1 %2123  ;;  %v4916_v26 = vpop.permute.xlu0 %2129 }
 0x47b   : > { %v2064_v0 = vpop.permute.xlu2 %2063 }
 0x47c   : > { %v2258_v55 = vperm.slane %v2064_v0, %v3781_v16 }
 0x47e   : > { %v2378_v53 = vsel %vm2299_vm13, %v2258_v55, %v2377_v47 }
 0x47f   : > { %v2379_v12 = vsel %vm2301_vm14, %v2259_v45, %v2378_v53  ;;  %v2277_v53 = vperm.slane %v2121_v24, %v3781_v16 }
 0x480   : > { %v2458_v31 = vsel %vm2424_vm15, %v2379_v12, 0.0  ;;  %v4923_v8 = vpop.permute.xlu1 %2132  ;;  %v2145_v49 = vpop.permute.xlu0 %2144 }
 0x481   : > { %2459 = vadd.xlane.f32.xlu1 %v2458_v31 }
 0x483   : > { %v2073_v63 = vpop.permute.xlu2 %2072 }
 0x484   : > { %v2261_v18 = vperm.slane %v2073_v63, %v3781_v16 }
 0x486   : > { %v2380_v33 = vsel %vm976_vm7, %v2261_v18, %v2260_v58  ;;  %v2278_v18 = vperm.slane %v2124_v39, %v3781_v16 }
 0x487   : > { %v2381_v5 = vsel %vm978_vm8, %v2262_v6, %v2380_v33 }
 0x488   : > { %v2382_v59 = vsel %vm980_vm9, %v2263_v3, %v2381_v5  ;;  %v4932_v25 = vpop.permute.xlu1 %2147  ;;  %v4934_v40 = vpop.permute.xlu0 %2153  ;;  %v2280_v3 = vperm.slane %v4916_v26, %v3781_v16 }
 0x48b   : > { %v2082_v10 = vpop.permute.xlu2 %2081 }
 0x48c   : > { %v2264_v41 = vperm.slane %v2082_v10, %v3781_v16 }
 0x48e   : > { %v2383_v14 = vsel %vm2295_vm11, %v2264_v41, %v2382_v59  ;;  %v2285_v41 = vperm.slane %v2145_v49, %v3781_v16 }
 0x48f   : > { %v2384_v1 = vsel %vm2297_vm12, %v2265_v4, %v2383_v14  ;;  %v2281_v14 = vperm.slane %v4923_v8, %v3781_v16 }
 0x490   : > { %v2385_v2 = vsel %vm2299_vm13, %v2266_v60, %v2384_v1  ;;  %v4948_v62 = vpop.permute.xlu1 %2156  ;;  %v4950_v43 = vpop.permute.xlu0 %2159 }
 0x493   : > { %v2091_v7 = vpop.permute.xlu2 %2090 }
 0x494   : > { %v2267_v36 = vperm.slane %v2091_v7, %v3781_v16 }
 0x496   : > { %v2386_v54 = vsel %vm2301_vm14, %v2267_v36, %v2385_v2  ;;  %v2286_v36 = vperm.slane %v4932_v25, %v3781_v16  ;;  %v2288_v25 = vperm.slane %v4934_v40, %v3781_v16 }
 0x497   : > { %v2461_v51 = vsel %vm2424_vm15, %v2386_v54, 0.0 }
 0x498   : > { %2462 = vadd.xlane.f32.xlu0 %v2461_v51  ;;  %v2139_v45 = vpop.permute.xlu1 %2138 }
 0x49a   : > { %2432 = vadd.xlane.f32.xlu2 %v2431_v37  ;;  %v2283_v37 = vperm.slane %v2139_v45, %v3781_v16 }
 0x49b   : > { %v2100_v11 = vpop.permute.xlu2 %2099 }
 0x49c   : > { %v2270_v32 = vperm.slane %v2100_v11, %v3781_v16 }
 0x49e   : > { %v2388_v19 = vsel %vm978_vm8, %v2270_v32, %v2387_v30 }
 0x49f   : > { %v2389_v46 = vsel %vm980_vm9, %v2271_v29, %v2388_v19 }
 0x4a0   : > { %v2390_v38 = vsel %vm2295_vm11, %v2272_v17, %v2389_v46 }
 0x4a2   : > { %2438 = vadd.xlane.f32.xlu2 %v2437_v27 }
 0x4a3   : > { %v2109_v20 = vpop.permute.xlu2 %2108 }
 0x4a4   : > { %v2273_v56 = vperm.slane %v2109_v20, %v3781_v16 }
 0x4a6   : > { %v2391_v42 = vsel %vm2297_vm12, %v2273_v56, %v2390_v38  ;;  %v2289_v38 = vperm.slane %v4948_v62, %v3781_v16 }
 0x4a7   : > { %v2392_v23 = vsel %vm2299_vm13, %v2274_v15, %v2391_v42 }
 0x4a8   : > { %v2393_v35 = vsel %vm2301_vm14, %v2275_v22, %v2392_v23 }
 0x4a9   : > { %v2464_v13 = vsel %vm2424_vm15, %v2393_v35, 0.0 }
 0x4aa   : > { %2447 = vadd.xlane.f32.xlu2 %v2446_v61 }
 0x4ab   : > { %v2118_v48 = vpop.permute.xlu2 %2117 }
 0x4ac   : > { %v2276_v9 = vperm.slane %v2118_v48, %v3781_v16 }
 0x4ae   : > { %v2394_v12 = vsel %vm976_vm7, %v2277_v53, %v2276_v9 }
 0x4af   : > { %v2395_v5 = vsel %vm978_vm8, %v2278_v18, %v2394_v12 }
 0x4b2   : > { %2456 = vadd.xlane.f32.xlu2 %v2455_v52  ;;  %v2290_v52 = vperm.slane %v4950_v43, %v3781_v16 }
 0x4b3   : > { %v2127_v57 = vpop.permute.xlu2 %2126 }
 0x4b4   : > { %v2279_v28 = vperm.slane %v2127_v57, %v3781_v16 }
 0x4b6   : > { %v2396_v10 = vsel %vm980_vm9, %v2279_v28, %v2395_v5 }
 0x4b7   : > { %v2397_v59 = vsel %vm2295_vm11, %v2280_v3, %v2396_v10 }
 0x4b8   : > { %v2398_v49 = vsel %vm2297_vm12, %v2281_v14, %v2397_v59 }
 0x4ba   : > { %2465 = vadd.xlane.f32.xlu2 %v2464_v13 }
 0x4bb   : > { %v2142_v0 = vpop.permute.xlu2 %2141  ;;  %v2427_v55 = vpop.xlane.xlu0 %2426 }
 0x4bc   : > { %v2941_v47 = vmul.f32 -1.442695, %v2427_v55  ;;  %v2284_v24 = vperm.slane %v2142_v0, %v3781_v16 }
 0x4be   : > { %3059 = vpow2.f32 %v2941_v47  ;;  %v2401_v4 = vsel %vm976_vm7, %v2285_v41, %v2284_v24 }
 0x4bf   : > { %v2402_v44 = vsel %vm978_vm8, %v2286_v36, %v2401_v4 }
 0x4c3   : > { %v2151_v31 = vpop.permute.xlu2 %2150  ;;  %v2436_v50 = vpop.xlane.xlu0 %2435 }
 0x4c4   : > { %v3060_v63 = vpop.eup %3059  ;;  %v2430_v58 = vpop.xlane.xlu1 %2429  ;;  %v2944_v33 = vmul.f32 -1.442695, %v2436_v50  ;;  %v2287_v1 = vperm.slane %v2151_v31, %v3781_v16  ;;  %v3123_v31 = vld [vmem:[%s3370_s6] sm:$0xff] }
 0x4c5   : > { %v2521_v6 = vadd.f32 1.0, %v3060_v63  ;;  %v2942_v21 = vmul.f32 -1.442695, %v2430_v58  ;;  %v3124_v63 = vld [vmem:[%s3370_s6 + $0x8] sm:$0xff] }
 0x4c6   : > { %3061 = vpow2.f32 %v2944_v33  ;;  %v2403_v34 = vsel %vm980_vm9, %v2287_v1, %v2402_v44 }
 0x4c7   : > { %3063 = vrcp.f32 %v2521_v6  ;;  %v2546_v29 = vand.u32 2147483647, %v2521_v6  ;;  %v2548_v48 = vand.u32 2147483648, %v2521_v6  ;;  %v2404_v56 = vsel %vm2295_vm11, %v2288_v25, %v2403_v34 }
 0x4c8   : > { %3065 = vpow2.f32 %v2942_v21  ;;  %vm2542_vm1 = vweird.f32 %v2521_v6  ;;  %v2405_v62 = vsel %vm2297_vm12, %v2289_v38, %v2404_v56  ;;  %v3128_v56 = vld [vmem:[%s3370_s6 + $0x18] sm:$0xff] }
 0x4c9   : > { %vm2547_vm3 = vcmp.eq.f32.partialorder %v2546_v29, 8.507059e+37  ;;  %v2549_v13 = vor.u32 1.1754944e-38, %v2548_v48  ;;  %v3127_v48 = vld [vmem:[%s3370_s6 + $0x10] sm:$0xff] }
 0x4cb   : > { %v2136_v60 = vpop.permute.xlu2 %2135  ;;  %v2445_v7 = vpop.xlane.xlu0 %2444 }
 0x4cc   : > { %v3062_v39 = vpop.eup %3061  ;;  %v2282_v26 = vperm.slane %v2136_v60, %v3781_v16  ;;  %v2442_v2 = vpop.xlane.xlu1 %2441  ;;  %v2947_v54 = vmul.f32 -1.442695, %v2445_v7  ;;  %v3133_v60 = vld [vmem:[%s3370_s6 + $0x90] sm:$0xff] }
 0x4cd   : > { %v3064_v51 = vpop.eup %3063  ;;  %v4976_v11 = vadd.f32 1.0, %v3062_v39  ;;  %v2946_v8 = vmul.f32 -1.442695, %v2442_v2 }
 0x4ce   : > { %v3066_v27 = vpop.eup %3065  ;;  %v2538_v20 = vmul.f32 %v3064_v51, %v2521_v6  ;;  %3067 = vpow2.f32 %v2947_v54  ;;  %v2399_v32 = vsel %vm2299_vm13, %v2282_v26, %v2398_v49  ;;  %vm2543_vm0 = vweird.f32 %v3064_v51 }
 0x4cf   : > { %v4982_v30 = vadd.f32 1.0, %v3066_v27  ;;  %3069 = vrcp.f32 %v4976_v11  ;;  %v2400_v61 = vsel %vm2301_vm14, %v2283_v37, %v2399_v32  ;;  %vm2544_vm2 = vmor %vm2542_vm1, %vm2543_vm0  ;;  %v2591_v6 = vand.u32 2147483647, %v4976_v11 }
 0x4d0   : > { %v2539_v19 = vsub.f32 1.0, %v2538_v20  ;;  %3071 = vpow2.f32 %v2946_v8  ;;  %v2467_v17 = vsel %vm2424_vm15, %v2400_v61, 0.0  ;;  %v2593_v24 = vand.u32 2147483648, %v4976_v11 }
 0x4d1   : > { %3073 = vrcp.f32 %v4982_v30  ;;  %2468 = vadd.xlane.f32.xlu1 %v2467_v17  ;;  %v2561_v5 = vand.u32 2147483647, %v4982_v30  ;;  %v2563_v10 = vand.u32 2147483648, %v4982_v30  ;;  %vm2557_vm5 = vweird.f32 %v4982_v30 }
 0x4d2   : > { %v2540_v46 = vmul.f32 %v3064_v51, %v2539_v19  ;;  %vm2587_vm7 = vweird.f32 %v4976_v11  ;;  %vm5021_vm8 = vcmp.eq.f32.partialorder %v2591_v6, 8.507059e+37  ;;  %v2594_v2 = vor.u32 1.1754944e-38, %v2593_v24  ;;  %v3126_v19 = vld [vmem:[%s3370_s6 + $0x38] sm:$0xff]  ;;  %v3132_v6 = vld [vmem:[%s3370_s6 + $0x68] sm:$0xff] }
 0x4d3   : > { %v2163_v42 = vpop.permute.xlu2 %2162  ;;  %v2454_v40 = vpop.xlane.xlu0 %2453  ;;  %vm5028_vm9 = vcmp.eq.f32.partialorder %v2561_v5, 8.507059e+37  ;;  %v2564_v37 = vor.u32 1.1754944e-38, %v2563_v10 }
 0x4d4   : > { %v3068_v15 = vpop.eup %3067  ;;  %v2541_v57 = vadd.f32 %v3064_v51, %v2540_v46  ;;  %v2451_v23 = vpop.xlane.xlu1 %2450  ;;  %v2950_v22 = vmul.f32 -1.442695, %v2454_v40  ;;  %v2291_v43 = vperm.slane %v2163_v42, %v3781_v16  ;;  %v2406_v16 = vsel %vm2299_vm13, %v2290_v52, %v2405_v62 }
 0x4d5   : > { %v3070_v35 = vpop.eup %3069  ;;  %v4995_v0 = vadd.f32 1.0, %v3068_v15  ;;  %v2949_v28 = vmul.f32 -1.442695, %v2451_v23 }
 0x4d6   : > { %v3072_v55 = vpop.eup %3071  ;;  %v2545_v45 = vsel %vm2544_vm2, %v3064_v51, %v2541_v57  ;;  %v2583_v47 = vmul.f32 %v3070_v35, %v4976_v11  ;;  %3075 = vpow2.f32 %v2950_v22  ;;  %vm2588_vm4 = vweird.f32 %v3070_v35 }
 0x4d7   : > { %v3074_v9 = vpop.eup %3073  ;;  %v2550_v53 = vsel %vm2547_vm3, %v2549_v13, %v2545_v45  ;;  %v5000_v12 = vadd.f32 1.0, %v3072_v55  ;;  %3077 = vrcp.f32 %v4995_v0  ;;  %v2407_v41 = vsel %vm2301_vm14, %v2291_v43, %v2406_v16  ;;  %vm2589_vm10 = vmor %vm2587_vm7, %vm2588_vm4 }
 0x4d8   : > { %v2777_v50 = vmul.f32 %v3123_v31, %v2550_v53  ;;  %v2778_v18 = vmul.f32 %v3124_v63, %v2550_v53  ;;  %v2553_v58 = vmul.f32 %v3074_v9, %v4982_v30  ;;  %v2584_v33 = vsub.f32 1.0, %v2583_v47  ;;  %v3125_v30 = vld [vmem:[%s3370_s6 + $0x30] sm:$0xff] }
 0x4d9   : > { %3079 = vrcp.f32 %v5000_v12  ;;  %vm2558_vm6 = vweird.f32 %v3074_v9  ;;  %v2470_v39 = vsel %vm2424_vm15, %v2407_v41, 0.0  ;;  %v2621_v8 = vand.u32 2147483647, %v5000_v12  ;;  %v3130_v63 = vld [vmem:[%s3370_s6 + $0x50] sm:$0xff] }
 0x4da   : > { %2809 = vst [vmem:[%s5011_s8] sm:$0xff] %v2777_v50  ;;  %v2554_v21 = vsub.f32 1.0, %v2553_v58  ;;  %v2585_v3 = vmul.f32 %v3070_v35, %v2584_v33  ;;  %3081 = vpow2.f32 %v2949_v28  ;;  %2471 = vadd.xlane.f32.xlu0 %v2470_v39  ;;  %vm2559_vm11 = vmor %vm2557_vm5, %vm2558_vm6  ;;  %v2638_v44 = vand.u32 2147483648, %v4995_v0  ;;  %v3131_v58 = vld [vmem:[%s3370_s6 + $0x58] sm:$0xff] }
 0x4db   : > { %2810 = vst [vmem:[%s5011_s8 + $0x8] sm:$0xff] %v2778_v18  ;;  %v2623_v40 = vand.u32 2147483648, %v5000_v12  ;;  %v2636_v52 = vand.u32 2147483647, %v4995_v0  ;;  %vm2632_vm14 = vweird.f32 %v4995_v0  ;;  %vm2617_vm15 = vweird.f32 %v5000_v12  ;;  %v3134_v39 = vld [vmem:[%s3370_s6 + $0x98] sm:$0xff] }
 0x4dc   : > { %v3076_v59 = vpop.eup %3075  ;;  %v2555_v14 = vmul.f32 %v3074_v9, %v2554_v21  ;;  %v2586_v1 = vadd.f32 %v3070_v35, %v2585_v3  ;;  %v2639_v13 = vor.u32 1.1754944e-38, %v2638_v44  ;;  %vm2622_vm2 = vcmp.eq.f32.partialorder %v2621_v8, 8.507059e+37 }
 0x4dd   : > { %v3078_v4 = vpop.eup %3077  ;;  %v5025_v7 = vadd.f32 1.0, %v3076_v59  ;;  %v2624_v55 = vor.u32 1.1754944e-38, %v2623_v40  ;;  %vm2637_vm3 = vcmp.eq.f32.partialorder %v2636_v52, 8.507059e+37  ;;  %v3137_v52 = vld [vmem:[%s3370_s6 + $0xb0] sm:$0xff] }
 0x4de   : > { %v2556_v36 = vadd.f32 %v3074_v9, %v2555_v14  ;;  %v2628_v54 = vmul.f32 %v3078_v4, %v4995_v0  ;;  %v2590_v11 = vsel %vm2589_vm10, %v3070_v35, %v2586_v1  ;;  %vm2633_vm12 = vweird.f32 %v3078_v4 }
 0x4df   : > { %v3080_v51 = vpop.eup %3079  ;;  %3083 = vrcp.f32 %v5025_v7  ;;  %v2595_v27 = vsel %vm5021_vm8, %v2594_v2, %v2590_v11  ;;  %vm2634_vm0 = vmor %vm2632_vm14, %vm2633_vm12  ;;  %v2683_v31 = vand.u32 2147483648, %v5025_v7  ;;  %vm2677_vm5 = vweird.f32 %v5025_v7  ;;  %v3135_v11 = vld [vmem:[%s3370_s6 + $0x80] sm:$0xff] }
 0x4e0   : > { %v2560_v49 = vsel %vm2559_vm11, %v3074_v9, %v2556_v36  ;;  %v2613_v20 = vmul.f32 %v3080_v51, %v5000_v12  ;;  %v3082_v32 = vpop.eup %3081  ;;  %v2783_v25 = vmul.f32 %v3125_v30, %v2595_v27  ;;  %v2784_v61 = vmul.f32 %v3126_v19, %v2595_v27  ;;  %v3129_v12 = vld [vmem:[%s3370_s6 + $0x60] sm:$0xff] }
 0x4e1   : > { %v2565_v34 = vsel %vm5028_vm9, %v2564_v37, %v2560_v49  ;;  %v2629_v29 = vsub.f32 1.0, %v2628_v54  ;;  %v5048_v42 = vadd.f32 1.0, %v3082_v32  ;;  %vm2618_vm13 = vweird.f32 %v3080_v51  ;;  %v3136_v49 = vld [vmem:[%s3370_s6 + $0x88] sm:$0xff] }
 0x4e2   : > { %v2779_v46 = vmul.f32 %v3127_v48, %v2565_v34  ;;  %v2780_v17 = vmul.f32 %v3128_v56, %v2565_v34  ;;  %v2614_v38 = vsub.f32 1.0, %v2613_v20  ;;  %2815 = vst [vmem:[%s5011_s8 + $0x30] sm:$0xff] %v2783_v25  ;;  %vm2619_vm1 = vmor %vm2617_vm15, %vm2618_vm13  ;;  %v2681_v9 = vand.u32 2147483647, %v5025_v7 }
 0x4e3   : > { %v2630_v15 = vmul.f32 %v3078_v4, %v2629_v29  ;;  %3085 = vrcp.f32 %v5048_v42  ;;  %2816 = vst [vmem:[%s5011_s8 + $0x38] sm:$0xff] %v2784_v61  ;;  %v2684_v3 = vor.u32 1.1754944e-38, %v2683_v31  ;;  %v2668_v41 = vand.u32 2147483648, %v5048_v42 }
 0x4e4   : > { %2811 = vst [vmem:[%s5011_s8 + $0x10] sm:$0xff] %v2779_v46  ;;  %v2615_v57 = vmul.f32 %v3080_v51, %v2614_v38  ;;  %vm2682_vm7 = vcmp.eq.f32.partialorder %v2681_v9, 8.507059e+37  ;;  %vm2662_vm9 = vweird.f32 %v5048_v42 }
 0x4e5   : > { %v3084_v23 = vpop.eup %3083  ;;  %2812 = vst [vmem:[%s5011_s8 + $0x18] sm:$0xff] %v2780_v17  ;;  %v2631_v22 = vadd.f32 %v3078_v4, %v2630_v15  ;;  %v2669_v2 = vor.u32 1.1754944e-38, %v2668_v41 }
 0x4e6   : > { %v2616_v35 = vadd.f32 %v3080_v51, %v2615_v57  ;;  %v2673_v62 = vmul.f32 %v3084_v23, %v5025_v7  ;;  %vm2678_vm4 = vweird.f32 %v3084_v23 }
 0x4e7   : > { %v2635_v45 = vsel %vm2634_vm0, %v3078_v4, %v2631_v22  ;;  %vm2679_vm6 = vmor %vm2677_vm5, %vm2678_vm4  ;;  %v2666_v4 = vand.u32 2147483647, %v5048_v42 }
 0x4e8   : > { %v2620_v47 = vsel %vm2619_vm1, %v3080_v51, %v2616_v35  ;;  %v2640_v43 = vsel %vm2637_vm3, %v2639_v13, %v2635_v45  ;;  %v2674_v0 = vsub.f32 1.0, %v2673_v62 }
 0x4e9   : > { %v2625_v53 = vsel %vm2622_vm2, %v2624_v55, %v2620_v47  ;;  %v2789_v28 = vmul.f32 %v3129_v12, %v2640_v43  ;;  %v3086_v50 = vpop.eup %3085  ;;  %v2790_v16 = vmul.f32 %v3132_v6, %v2640_v43  ;;  %vm2667_vm11 = vcmp.eq.f32.partialorder %v2666_v4, 8.507059e+37 }
 0x4ea   : > { %v2787_v18 = vmul.f32 %v3130_v63, %v2625_v53  ;;  %v2788_v33 = vmul.f32 %v3131_v58, %v2625_v53  ;;  %v2675_v21 = vmul.f32 %v3084_v23, %v2674_v0  ;;  %v2658_v5 = vmul.f32 %v3086_v50, %v5048_v42 }
 0x4eb   : > { %2821 = vst [vmem:[%s5011_s8 + $0x60] sm:$0xff] %v2789_v28  ;;  %vm2663_vm8 = vweird.f32 %v3086_v50 }
 0x4ec   : > { %2819 = vst [vmem:[%s5011_s8 + $0x50] sm:$0xff] %v2787_v18  ;;  %v2676_v10 = vadd.f32 %v3084_v23, %v2675_v21  ;;  %v2659_v24 = vsub.f32 1.0, %v2658_v5  ;;  %vm2664_vm10 = vmor %vm2662_vm9, %vm2663_vm8 }
 0x4ed   : > { %2820 = vst [vmem:[%s5011_s8 + $0x58] sm:$0xff] %v2788_v33 }
 0x4ee   : > { %2822 = vst [vmem:[%s5011_s8 + $0x68] sm:$0xff] %v2790_v16  ;;  %v2680_v59 = vsel %vm2679_vm6, %v3084_v23, %v2676_v10  ;;  %v2660_v14 = vmul.f32 %v3086_v50, %v2659_v24  ;;  %v3138_v23 = vld [vmem:[%s3370_s6 + $0xb8] sm:$0xff] }
 0x4ef   : > { %v2685_v1 = vsel %vm2682_vm7, %v2684_v3, %v2680_v59 }
 0x4f0   : > { %v2795_v7 = vmul.f32 %v3133_v60, %v2685_v1  ;;  %v2796_v36 = vmul.f32 %v3134_v39, %v2685_v1  ;;  %v2661_v26 = vadd.f32 %v3086_v50, %v2660_v14  ;;  %v3139_v39 = vld [vmem:[%s3370_s6 + $0xc0] sm:$0xff] }
 0x4f2   : > { %2827 = vst [vmem:[%s5011_s8 + $0x90] sm:$0xff] %v2795_v7  ;;  %v2665_v54 = vsel %vm2664_vm10, %v3086_v50, %v2661_v26  ;;  %v3140_v26 = vld [vmem:[%s3370_s6 + $0xc8] sm:$0xff] }
 0x4f3   : > { %2828 = vst [vmem:[%s5011_s8 + $0x98] sm:$0xff] %v2796_v36  ;;  %v2670_v51 = vsel %vm2667_vm11, %v2669_v2, %v2665_v54 }
 0x4f4   : > { %v2460_v37 = vpop.xlane.xlu1 %2459  ;;  %v2793_v8 = vmul.f32 %v3135_v11, %v2670_v51  ;;  %v2794_v27 = vmul.f32 %v3136_v49, %v2670_v51  ;;  %v3141_v49 = vld [vmem:[%s3370_s6 + $0x20] sm:$0xff] }
 0x4f5   : > { %v2952_v20 = vmul.f32 -1.442695, %v2460_v37 }
 0x4f6   : > { %2825 = vst [vmem:[%s5011_s8 + $0x80] sm:$0xff] %v2793_v8 }
 0x4f7   : > { %3087 = vpow2.f32 %v2952_v20  ;;  %2826 = vst [vmem:[%s5011_s8 + $0x88] sm:$0xff] %v2794_v27  ;;  %v3142_v20 = vld [vmem:[%s3370_s6 + $0x28] sm:$0xff] }
 0x4fd   : > { %v3088_v44 = vpop.eup %3087 }
 0x4fe   : > { %v2532_v32 = vadd.f32 1.0, %v3088_v44 }
 0x500   : > { %3089 = vrcp.f32 %v2532_v32  ;;  %v2713_v19 = vand.u32 2147483648, %v2532_v32  ;;  %v2711_v29 = vand.u32 2147483647, %v2532_v32  ;;  %vm2707_vm13 = vweird.f32 %v2532_v32 }
 0x502   : > { %v2714_v38 = vor.u32 1.1754944e-38, %v2713_v19  ;;  %vm2712_vm15 = vcmp.eq.f32.partialorder %v2711_v29, 8.507059e+37 }
 0x506   : > { %v3090_v34 = vpop.eup %3089 }
 0x507   : > { %v2703_v30 = vmul.f32 %v3090_v34, %v2532_v32  ;;  %vm2708_vm12 = vweird.f32 %v3090_v34 }
 0x508   : > { %vm2709_vm14 = vmor %vm2707_vm13, %vm2708_vm12 }
 0x509   : > { %v2704_v25 = vsub.f32 1.0, %v2703_v30 }
 0x50b   : > { %v2705_v61 = vmul.f32 %v3090_v34, %v2704_v25  ;;  %v2463_v48 = vpop.xlane.xlu0 %2462 }
 0x50c   : > { %v2953_v46 = vmul.f32 -1.442695, %v2463_v48 }
 0x50d   : > { %v2706_v56 = vadd.f32 %v3090_v34, %v2705_v61  ;;  %v2433_v17 = vpop.xlane.xlu2 %2432 }
 0x50e   : > { %3091 = vpow2.f32 %v2953_v46  ;;  %v2943_v42 = vmul.f32 -1.442695, %v2433_v17 }
 0x50f   : > { %v2710_v40 = vsel %vm2709_vm14, %v3090_v34, %v2706_v56 }
 0x510   : > { %v2715_v15 = vsel %vm2712_vm15, %v2714_v38, %v2710_v40  ;;  %3093 = vpow2.f32 %v2943_v42  ;;  %v3143_v40 = vld [vmem:[%s3370_s6 + $0x40] sm:$0xff] }
 0x511   : > { %v2799_v57 = vmul.f32 %v3137_v52, %v2715_v15  ;;  %v2800_v22 = vmul.f32 %v3138_v23, %v2715_v15  ;;  %v3144_v52 = vld [vmem:[%s3370_s6 + $0x48] sm:$0xff] }
 0x513   : > { %2831 = vst [vmem:[%s5011_s8 + $0xb0] sm:$0xff] %v2799_v57 }
 0x514   : > { %v3092_v35 = vpop.eup %3091  ;;  %2832 = vst [vmem:[%s5011_s8 + $0xb8] sm:$0xff] %v2800_v22 }
 0x515   : > { %v2533_v13 = vadd.f32 1.0, %v3092_v35  ;;  %v2439_v62 = vpop.xlane.xlu2 %2438 }
 0x516   : > { %v3094_v55 = vpop.eup %3093  ;;  %v2945_v45 = vmul.f32 -1.442695, %v2439_v62 }
 0x517   : > { %3095 = vrcp.f32 %v2533_v13  ;;  %v2523_v47 = vadd.f32 1.0, %v3094_v55  ;;  %v2728_v63 = vand.u32 2147483648, %v2533_v13  ;;  %v2726_v33 = vand.u32 2147483647, %v2533_v13 }
 0x518   : > { %3097 = vpow2.f32 %v2945_v45  ;;  %vm2722_vm1 = vweird.f32 %v2533_v13 }
 0x519   : > { %3099 = vrcp.f32 %v2523_v47  ;;  %v2578_v21 = vand.u32 2147483648, %v2523_v47  ;;  %v2729_v5 = vor.u32 1.1754944e-38, %v2728_v63  ;;  %v2576_v24 = vand.u32 2147483647, %v2523_v47 }
 0x51a   : > { %vm2727_vm4 = vcmp.eq.f32.partialorder %v2726_v33, 8.507059e+37  ;;  %vm2572_vm5 = vweird.f32 %v2523_v47 }
 0x51b   : > { %v2579_v54 = vor.u32 1.1754944e-38, %v2578_v21  ;;  %vm2577_vm7 = vcmp.eq.f32.partialorder %v2576_v24, 8.507059e+37 }
 0x51d   : > { %v3096_v43 = vpop.eup %3095  ;;  %v2448_v0 = vpop.xlane.xlu2 %2447 }
 0x51e   : > { %v3098_v9 = vpop.eup %3097  ;;  %v2718_v53 = vmul.f32 %v3096_v43, %v2533_v13  ;;  %v2948_v12 = vmul.f32 -1.442695, %v2448_v0  ;;  %vm2723_vm0 = vweird.f32 %v3096_v43 }
 0x51f   : > { %v5088_v28 = vadd.f32 1.0, %v3098_v9  ;;  %v3100_v31 = vpop.eup %3099  ;;  %vm2724_vm2 = vmor %vm2722_vm1, %vm2723_vm0 }
 0x520   : > { %v2719_v50 = vsub.f32 1.0, %v2718_v53  ;;  %3101 = vpow2.f32 %v2948_v12  ;;  %v2568_v18 = vmul.f32 %v3100_v31, %v2523_v47  ;;  %vm2573_vm3 = vweird.f32 %v3100_v31  ;;  %v3145_v53 = vld [vmem:[%s3370_s6 + $0x70] sm:$0xff] }
 0x521   : > { %3103 = vrcp.f32 %v5088_v28  ;;  %vm2574_vm6 = vmor %vm2572_vm5, %vm2573_vm3  ;;  %v2608_v32 = vand.u32 2147483648, %v5088_v28  ;;  %v2606_v30 = vand.u32 2147483647, %v5088_v28  ;;  %vm2602_vm9 = vweird.f32 %v5088_v28 }
 0x522   : > { %v2720_v58 = vmul.f32 %v3096_v43, %v2719_v50  ;;  %v2569_v6 = vsub.f32 1.0, %v2568_v18 }
 0x523   : > { %v2609_v48 = vor.u32 1.1754944e-38, %v2608_v32  ;;  %vm2607_vm11 = vcmp.eq.f32.partialorder %v2606_v30, 8.507059e+37 }
 0x524   : > { %v2721_v16 = vadd.f32 %v3096_v43, %v2720_v58  ;;  %v2570_v10 = vmul.f32 %v3100_v31, %v2569_v6 }
 0x525   : > { %v2457_v3 = vpop.xlane.xlu2 %2456 }
 0x526   : > { %v3102_v41 = vpop.eup %3101  ;;  %v2725_v59 = vsel %vm2724_vm2, %v3096_v43, %v2721_v16  ;;  %v2951_v14 = vmul.f32 -1.442695, %v2457_v3  ;;  %v2571_v60 = vadd.f32 %v3100_v31, %v2570_v10 }
 0x527   : > { %v3104_v4 = vpop.eup %3103  ;;  %v2730_v1 = vsel %vm2727_vm4, %v2729_v5, %v2725_v59  ;;  %v2528_v7 = vadd.f32 1.0, %v3102_v41 }
 0x528   : > { %v2801_v36 = vmul.f32 %v3139_v39, %v2730_v1  ;;  %v2802_v2 = vmul.f32 %v3140_v26, %v2730_v1  ;;  %v2598_v51 = vmul.f32 %v3104_v4, %v5088_v28  ;;  %v2575_v37 = vsel %vm2574_vm6, %v3100_v31, %v2571_v60  ;;  %v3146_v28 = vld [vmem:[%s3370_s6 + $0x78] sm:$0xff]  ;;  %v3148_v1 = vld [vmem:[%s3370_s6 + $0xa8] sm:$0xff] }
 0x529   : > { %3105 = vrcp.f32 %v2528_v7  ;;  %v2580_v11 = vsel %vm2577_vm7, %v2579_v54, %v2575_v37  ;;  %vm2603_vm8 = vweird.f32 %v3104_v4  ;;  %v2653_v22 = vand.u32 2147483648, %v2528_v7  ;;  %v3149_v37 = vld [vmem:[%s3370_s6 + $0xd0] sm:$0xff] }
 0x52a   : > { %2833 = vst [vmem:[%s5011_s8 + $0xc0] sm:$0xff] %v2801_v36  ;;  %v2599_v8 = vsub.f32 1.0, %v2598_v51  ;;  %3107 = vpow2.f32 %v2951_v14  ;;  %v2781_v27 = vmul.f32 %v3141_v49, %v2580_v11  ;;  %v2782_v44 = vmul.f32 %v3142_v20, %v2580_v11  ;;  %vm2604_vm10 = vmor %vm2602_vm9, %vm2603_vm8  ;;  %v3147_v14 = vld [vmem:[%s3370_s6 + $0xa0] sm:$0xff] }
 0x52b   : > { %2834 = vst [vmem:[%s5011_s8 + $0xc8] sm:$0xff] %v2802_v2  ;;  %v2651_v13 = vand.u32 2147483647, %v2528_v7  ;;  %vm2647_vm13 = vweird.f32 %v2528_v7  ;;  %v2654_v45 = vor.u32 1.1754944e-38, %v2653_v22 }
 0x52c   : > { %v2600_v34 = vmul.f32 %v3104_v4, %v2599_v8  ;;  %2813 = vst [vmem:[%s5011_s8 + $0x20] sm:$0xff] %v2781_v27  ;;  %v3150_v8 = vld [vmem:[%s3370_s6 + $0xd8] sm:$0xff] }
 0x52d   : > { %v2466_v25 = vpop.xlane.xlu2 %2465  ;;  %2814 = vst [vmem:[%s5011_s8 + $0x28] sm:$0xff] %v2782_v44  ;;  %vm2652_vm15 = vcmp.eq.f32.partialorder %v2651_v13, 8.507059e+37 }
 0x52e   : > { %v2601_v19 = vadd.f32 %v3104_v4, %v2600_v34  ;;  %v2954_v61 = vmul.f32 -1.442695, %v2466_v25 }
 0x52f   : > { %v3106_v29 = vpop.eup %3105 }
 0x530   : > { %v3108_v46 = vpop.eup %3107  ;;  %v2605_v56 = vsel %vm2604_vm10, %v3104_v4, %v2601_v19  ;;  %v2643_v17 = vmul.f32 %v3106_v29, %v2528_v7  ;;  %3109 = vpow2.f32 %v2954_v61  ;;  %vm2648_vm12 = vweird.f32 %v3106_v29 }
 0x531   : > { %v2610_v38 = vsel %vm2607_vm11, %v2609_v48, %v2605_v56  ;;  %v2531_v42 = vadd.f32 1.0, %v3108_v46  ;;  %vm2649_vm14 = vmor %vm2647_vm13, %vm2648_vm12 }
 0x532   : > { %v2785_v15 = vmul.f32 %v3143_v40, %v2610_v38  ;;  %v2786_v57 = vmul.f32 %v3144_v52, %v2610_v38  ;;  %v2644_v23 = vsub.f32 1.0, %v2643_v17  ;;  %v3151_v40 = vld [vmem:[%s3370_s6 + $0xe0] sm:$0xff]  ;;  %v3152_v52 = vld [vmem:[%s3370_s6 + $0xe8] sm:$0xff] }
 0x533   : > { %3111 = vrcp.f32 %v2531_v42  ;;  %v2698_v18 = vand.u32 2147483648, %v2531_v42  ;;  %v2696_v33 = vand.u32 2147483647, %v2531_v42  ;;  %vm2692_vm1 = vweird.f32 %v2531_v42 }
 0x534   : > { %2817 = vst [vmem:[%s5011_s8 + $0x40] sm:$0xff] %v2785_v15  ;;  %v2645_v35 = vmul.f32 %v3106_v29, %v2644_v23 }
 0x535   : > { %2818 = vst [vmem:[%s5011_s8 + $0x48] sm:$0xff] %v2786_v57  ;;  %v2699_v5 = vor.u32 1.1754944e-38, %v2698_v18  ;;  %vm2697_vm3 = vcmp.eq.f32.partialorder %v2696_v33, 8.507059e+37 }
 0x536   : > { %v3110_v62 = vpop.eup %3109  ;;  %v2646_v55 = vadd.f32 %v3106_v29, %v2645_v35 }
 0x537   : > { %v2534_v47 = vadd.f32 1.0, %v3110_v62 }
 0x538   : > { %v2650_v43 = vsel %vm2649_vm14, %v3106_v29, %v2646_v55 }
 0x539   : > { %v3112_v0 = vpop.eup %3111  ;;  %v2655_v9 = vsel %vm2652_vm15, %v2654_v45, %v2650_v43  ;;  %3113 = vrcp.f32 %v2534_v47  ;;  %v2741_v41 = vand.u32 2147483647, %v2534_v47  ;;  %v2743_v59 = vand.u32 2147483648, %v2534_v47 }
 0x53a   : > { %v2791_v12 = vmul.f32 %v3145_v53, %v2655_v9  ;;  %v2792_v31 = vmul.f32 %v3146_v28, %v2655_v9  ;;  %v2688_v50 = vmul.f32 %v3112_v0, %v2531_v42  ;;  %vm2693_vm0 = vweird.f32 %v3112_v0  ;;  %v3153_v9 = vld [vmem:[%s3370_s6 + $0xf0] sm:$0xff] }
 0x53b   : > { %vm2694_vm2 = vmor %vm2692_vm1, %vm2693_vm0  ;;  %vm2737_vm5 = vweird.f32 %v2534_v47  ;;  %v2744_v26 = vor.u32 1.1754944e-38, %v2743_v59  ;;  %vm2742_vm7 = vcmp.eq.f32.partialorder %v2741_v41, 8.507059e+37 }
 0x53c   : > { %2823 = vst [vmem:[%s5011_s8 + $0x70] sm:$0xff] %v2791_v12  ;;  %v2689_v63 = vsub.f32 1.0, %v2688_v50  ;;  %v3154_v12 = vld [vmem:[%s3370_s6 + $0xf8] sm:$0xff] }
 0x53d   : > { %2824 = vst [vmem:[%s5011_s8 + $0x78] sm:$0xff] %v2792_v31 }
 0x53e   : > { %v2690_v58 = vmul.f32 %v3112_v0, %v2689_v63 }
 0x53f   : > { %v3114_v6 = vpop.eup %3113 }
 0x540   : > { %v2691_v16 = vadd.f32 %v3112_v0, %v2690_v58  ;;  %v2733_v21 = vmul.f32 %v3114_v6, %v2534_v47  ;;  %vm2738_vm4 = vweird.f32 %v3114_v6 }
 0x541   : > { %vm2739_vm6 = vmor %vm2737_vm5, %vm2738_vm4 }
 0x542   : > { %v2695_v10 = vsel %vm2694_vm2, %v3112_v0, %v2691_v16  ;;  %v2734_v24 = vsub.f32 1.0, %v2733_v21 }
 0x543   : > { %v2700_v3 = vsel %vm2697_vm3, %v2699_v5, %v2695_v10 }
 0x544   : > { %v2797_v4 = vmul.f32 %v3147_v14, %v2700_v3  ;;  %v2798_v60 = vmul.f32 %v3148_v1, %v2700_v3  ;;  %v2735_v7 = vmul.f32 %v3114_v6, %v2734_v24  ;;  %v2469_v36 = vpop.xlane.xlu1 %2468 }
 0x545   : > { %v2955_v2 = vmul.f32 -1.442695, %v2469_v36 }
 0x546   : > { %2829 = vst [vmem:[%s5011_s8 + $0xa0] sm:$0xff] %v2797_v4  ;;  %v2736_v39 = vadd.f32 %v3114_v6, %v2735_v7 }
 0x547   : > { %2830 = vst [vmem:[%s5011_s8 + $0xa8] sm:$0xff] %v2798_v60  ;;  %3115 = vpow2.f32 %v2955_v2 }
 0x548   : > { %v2740_v54 = vsel %vm2739_vm6, %v3114_v6, %v2736_v39 }
 0x549   : > { %v2745_v51 = vsel %vm2742_vm7, %v2744_v26, %v2740_v54 }
 0x54a   : > { %v2803_v11 = vmul.f32 %v3149_v37, %v2745_v51  ;;  %v2804_v49 = vmul.f32 %v3150_v8, %v2745_v51 }
 0x54c   : > { %2835 = vst [vmem:[%s5011_s8 + $0xd0] sm:$0xff] %v2803_v11 }
 0x54d   : > { %2836 = vst [vmem:[%s5011_s8 + $0xd8] sm:$0xff] %v2804_v49  ;;  %v3116_v27 = vpop.eup %3115  ;;  %v2472_v44 = vpop.xlane.xlu0 %2471 }
 0x54e   : > { %v2535_v20 = vadd.f32 1.0, %v3116_v27  ;;  %v2956_v32 = vmul.f32 -1.442695, %v2472_v44 }
 0x550   : > { %3117 = vrcp.f32 %v2535_v20  ;;  %v2758_v61 = vand.u32 2147483648, %v2535_v20  ;;  %v2756_v46 = vand.u32 2147483647, %v2535_v20  ;;  %vm2752_vm9 = vweird.f32 %v2535_v20 }
 0x551   : > { %3119 = vpow2.f32 %v2956_v32 }
 0x552   : > { %v2759_v17 = vor.u32 1.1754944e-38, %v2758_v61  ;;  %vm2757_vm11 = vcmp.eq.f32.partialorder %v2756_v46, 8.507059e+37 }
 0x556   : > { %v3118_v34 = vpop.eup %3117 }
 0x557   : > { %v2748_v30 = vmul.f32 %v3118_v34, %v2535_v20  ;;  %v3120_v25 = vpop.eup %3119  ;;  %vm2753_vm8 = vweird.f32 %v3118_v34 }
 0x558   : > { %v2536_v29 = vadd.f32 1.0, %v3120_v25  ;;  %vm2754_vm10 = vmor %vm2752_vm9, %vm2753_vm8 }
 0x559   : > { %v2749_v19 = vsub.f32 1.0, %v2748_v30 }
 0x55a   : > { %3121 = vrcp.f32 %v2536_v29  ;;  %v2773_v13 = vand.u32 2147483648, %v2536_v29  ;;  %v2771_v55 = vand.u32 2147483647, %v2536_v29  ;;  %vm2767_vm13 = vweird.f32 %v2536_v29 }
 0x55b   : > { %v2750_v48 = vmul.f32 %v3118_v34, %v2749_v19 }
 0x55c   : > { %v2774_v47 = vor.u32 1.1754944e-38, %v2773_v13  ;;  %vm2772_vm15 = vcmp.eq.f32.partialorder %v2771_v55, 8.507059e+37 }
 0x55d   : > { %v2751_v56 = vadd.f32 %v3118_v34, %v2750_v48 }
 0x55f   : > { %v2755_v38 = vsel %vm2754_vm10, %v3118_v34, %v2751_v56 }
 0x560   : > { %v2760_v42 = vsel %vm2757_vm11, %v2759_v17, %v2755_v38  ;;  %v3122_v23 = vpop.eup %3121 }
 0x561   : > { %v2805_v15 = vmul.f32 %v3151_v40, %v2760_v42  ;;  %v2806_v57 = vmul.f32 %v3152_v52, %v2760_v42  ;;  %v2763_v22 = vmul.f32 %v3122_v23, %v2536_v29  ;;  %vm2768_vm12 = vweird.f32 %v3122_v23 }
 0x562   : > { %vm2769_vm14 = vmor %vm2767_vm13, %vm2768_vm12 }
 0x563   : > { %2837 = vst [vmem:[%s5011_s8 + $0xe0] sm:$0xff] %v2805_v15  ;;  %v2764_v35 = vsub.f32 1.0, %v2763_v22 }
 0x564   : > { %2838 = vst [vmem:[%s5011_s8 + $0xe8] sm:$0xff] %v2806_v57 }
 0x565   : > { %v2765_v62 = vmul.f32 %v3122_v23, %v2764_v35 }
 0x567   : > { %v2766_v45 = vadd.f32 %v3122_v23, %v2765_v62 }
 0x569   : > { %v2770_v43 = vsel %vm2769_vm14, %v3122_v23, %v2766_v45 }
 0x56a   : > { %v2775_v0 = vsel %vm2772_vm15, %v2774_v47, %v2770_v43 }
 0x56b   : > { %v2807_v53 = vmul.f32 %v3153_v9, %v2775_v0  ;;  %v2808_v28 = vmul.f32 %v3154_v12, %v2775_v0 }
 0x56d   : > { %2839 = vst [vmem:[%s5011_s8 + $0xf0] sm:$0xff] %v2807_v53 }
 0x56e   : > { %2840 = vst [vmem:[%s5011_s8 + $0xf8] sm:$0xff] %v2808_v28 }
 0x56f   : > { %3212 = shalt.err (!%p3209_p4)
}
 0x570   : > { %s3256_s29 = smov 256   ;;  %s3257_s6 = smov 16  }
 0x571   : > { %2969 = dma.vmem_to_hbm [thread:$0]  (%p3328_p11), %s2856_s17, 4096, %s2858_s16, %s2842_s19, %s3256_s29, %s3256_s29, %s3257_s6  }
 0x572 PF: > { %s2872_s5 = sand.u32 1, %s3239_s12   ;;  %p5250_p7 = scmp.ge.s32.totalorder %s3251_s15, 2 }
 0x573   : > { %s2873_s7 = scalar_lea.sflag [#allocation4], %s2872_s5 }
 0x574   : > { %p2976_p5 = pnand %p5250_p7, %p3332_p12 }
 0x576   : > { %p2977_p8 = pneg %p2976_p5 }
 0x578   : > { %3234 = dma.done.wait (%p2977_p8), %s2873_s7, 4096  }
 0x579   : > { %3236 = vsyncadd (%p2977_p8), %s2873_s7, 4294963200  ;;  %p16_p10 = scmp.ge.s32.totalorder %s3303_s18, 4   ;;  %s5251_s12 = smov %s3243_s13 }
 0x57a   : > { %s5252_s13 = smov %s3247_s14  ;;  %s5253_s14 = smov %s3315_s21 }
 0x57b   : > { %s5254_s15 = smov %s3303_s18  ;;  %18 = sbr.rel (!%p16_p10) target bundleno = 5 (0x5), region = 77 }
 0x580   :  { %2879 = vsyncpa [#allocation3], 1 }
 0x581   :  { %2881 = vsyncpa [#allocation3 + $0x1], 1 }
 0x582   :  { %2882 = vsyncpa [#allocation4], 1 }
 0x583   :  { %2884 = vsyncpa [#allocation4 + $0x1], 1 }

</bundles_post_ra>
